<compile_context>
chip_gen: v6e
topology: v6e:2x2x1
jax: 0.10.0
libtpu: 0.0.40
codegen_flags: <defaults>
</compile_context>

<pallas_src>
import functools

import jax
import jax.numpy as jnp
from jax.experimental import pallas as pl
from jax.experimental.pallas import tpu as pltpu

LANE = 128


def _round_up(n, m=LANE):
    return max(m, ((n + m - 1) // m) * m)


def reason_e_kernel(n_pair, b_pad, bn_pad, ue_pad, uc_pad,
                    margin_ref, ent_idx_ref, con_idx_ref,
                    entT_ref, chT_ref, ctT_ref, out_ref):
    """Single-block fused gather + loss kernel.

    entT_ref/chT_ref/ctT_ref: [3, D, E_pad] bf16 planes; the f32 sum of the
        three planes equals the (transposed, zero-padded) embedding table.
    ent_idx_ref: [1, 2*n_pair + ue_pad] int32  (heads+/-, tails+/-, uniqE)
    con_idx_ref: [1, n_pair + uc_pad]   int32  (pair concepts, uniqBC)
    out_ref:     [1, b_pad + bn_pad + ue_pad + 2*uc_pad] f32 packed losses.
    Layout: [D, N] (embedding dim on sublanes, gathered rows on lanes) so all
    reductions and stores are lane-dense.
    """
    margin = margin_ref[0]
    n_ent = ent_idx_ref.shape[1]
    n_con = con_idx_ref.shape[1]
    e_ent = entT_ref.shape[2]
    e_con = chT_ref.shape[2]

    def onehot(idx_ref, n_rows, n_cols):
        rows = jax.lax.broadcasted_iota(jnp.int32, (n_rows, n_cols), 0)
        return jnp.where(rows == idx_ref[...], 1.0, 0.0).astype(jnp.bfloat16)

    def gather(tabT_ref, oh):
        # Exact f32 gather on the MXU: sum of three bf16 plane matmuls
        # (bf16 inputs, f32 accumulation) -> [D, N].
        return (jnp.dot(tabT_ref[0], oh, preferred_element_type=jnp.float32)
                + jnp.dot(tabT_ref[1], oh, preferred_element_type=jnp.float32)
                + jnp.dot(tabT_ref[2], oh, preferred_element_type=jnp.float32))

    oh_ent = onehot(ent_idx_ref, e_ent, n_ent)
    oh_con = onehot(con_idx_ref, e_con, n_con)

    ent = gather(entT_ref, oh_ent)   # [D, 2*n_pair + ue_pad]
    ch = gather(chT_ref, oh_con)     # [D, n_pair + uc_pad]
    ct = gather(ctT_ref, oh_con)     # [D, n_pair + uc_pad]

    # Lane-packed column segments (all offsets are multiples of 128).
    he = ent[:, 0:n_pair]                       # heads (positives then negatives)
    te = ent[:, n_pair:2 * n_pair]              # tails (positives then negatives)
    ue = ent[:, 2 * n_pair:2 * n_pair + ue_pad]  # unique entities
    chp = ch[:, 0:n_pair]
    ctp = ct[:, 0:n_pair]
    chu = ch[:, n_pair:n_pair + uc_pad]
    ctu = ct[:, n_pair:n_pair + uc_pad]

    # ---- pair membership energy (positive + negative share the math) -----
    th = (1.0 - chp) * he
    tt = (1.0 - ctp) * te
    pair = (jnp.sum(th * th, axis=0, keepdims=True)
            + jnp.sum(tt * tt, axis=0, keepdims=True))        # [1, n_pair]
    member = pair[:, 0:b_pad]                                 # bE2CMemberL
    disc = jnp.maximum(margin - pair[:, b_pad:n_pair], 0.0)   # bE2CDiscMemberL

    # ---- entity norm loss -------------------------------------------------
    t_e = jnp.sum(ue * ue, axis=0, keepdims=True) - 1.0
    enorm = t_e * t_e                                         # uniqENormL

    # ---- binary-concept basis alignment & count losses --------------------
    ah = chu * (1.0 - chu)
    at = ctu * (1.0 - ctu)
    align = (jnp.sum(ah * ah, axis=0, keepdims=True)
             + jnp.sum(at * at, axis=0, keepdims=True))       # uniqBCBasisAlignL
    count = (jnp.maximum(1.0 - jnp.sum(jnp.abs(chu), axis=0, keepdims=True), 0.0)
             + jnp.maximum(1.0 - jnp.sum(jnp.abs(ctu), axis=0, keepdims=True), 0.0))

    # ---- consolidated lane-dense stores (128-aligned, unmasked) -----------
    o1 = b_pad
    o2 = o1 + bn_pad
    o3 = o2 + ue_pad
    o4 = o3 + uc_pad
    out_ref[:, 0:o1] = member
    out_ref[:, o1:o2] = disc
    out_ref[:, o2:o3] = enorm
    out_ref[:, o3:o4] = align
    out_ref[:, o4:o4 + uc_pad] = count


def init_params(key, entity_count, b_concept_count, embed_dim):
    """xavier_uniform_ followed by row-wise L2 normalization (as in __init__)."""
    k1, k2, k3 = jax.random.split(key, 3)

    def xavier_normed(k, n, d):
        bound = (6.0 / (n + d)) ** 0.5
        w = jax.random.uniform(k, (n, d), jnp.float32, -bound, bound)
        return w / jnp.linalg.norm(w, axis=1, keepdims=True)

    entity_w = xavier_normed(k1, entity_count, embed_dim)
    bch_w = xavier_normed(k2, b_concept_count, embed_dim)
    bct_w = xavier_normed(k3, b_concept_count, embed_dim)
    return entity_w, bch_w, bct_w


def prepare_params(params):
    """One-time: transpose each [E, D] table to [D, E_pad] and split into
    3 bf16 planes whose f32 sum reconstructs the table exactly."""
    def split_t(w):
        e, _ = w.shape
        w_t = jnp.pad(w.T.astype(jnp.float32), ((0, 0), (0, _round_up(e) - e)))
        p0 = w_t.astype(jnp.bfloat16)
        r1 = w_t - p0.astype(jnp.float32)
        p1 = r1.astype(jnp.bfloat16)
        r2 = r1 - p1.astype(jnp.float32)
        p2 = r2.astype(jnp.bfloat16)
        return jnp.stack([p0, p1, p2])            # [3, D, E_pad] bf16

    entity_w, bch_w, bct_w = params
    return split_t(entity_w), split_t(bch_w), split_t(bct_w)


def reason_e_forward(prep_params, aBHE, aBTE, aBC, nABHE, nABTE, nABC,
                     uniqE, uniqBC, lossMargin):
    entT, chT, ctT = prep_params
    B, Bn = aBHE.shape[0], nABHE.shape[0]
    Ue, Uc = uniqE.shape[0], uniqBC.shape[0]
    B_pad, Bn_pad, Ue_pad, Uc_pad = (_round_up(B), _round_up(Bn),
                                     _round_up(Ue), _round_up(Uc))
    NP = B_pad + Bn_pad

    def pad(idx, n):  # pad with index 0 (a valid row); garbage lanes sliced off
        return jnp.pad(idx.astype(jnp.int32), (0, n - idx.shape[0]))

    # Tiny packed int32 index vectors are the only per-step tensor inputs;
    # the embedding activations never round-trip through HBM.
    ent_idx = jnp.concatenate([pad(aBHE, B_pad), pad(nABHE, Bn_pad),
                               pad(aBTE, B_pad), pad(nABTE, Bn_pad),
                               pad(uniqE, Ue_pad)])[None, :]
    con_idx = jnp.concatenate([pad(aBC, B_pad), pad(nABC, Bn_pad),
                               pad(uniqBC, Uc_pad)])[None, :]

    margin = jnp.reshape(jnp.asarray(lossMargin, jnp.float32), (1,))

    total = B_pad + Bn_pad + Ue_pad + 2 * Uc_pad
    vmem = pl.BlockSpec(memory_space=pltpu.MemorySpace.VMEM)
    smem = pl.BlockSpec(memory_space=pltpu.MemorySpace.SMEM)

    out = pl.pallas_call(
        functools.partial(reason_e_kernel, NP, B_pad, Bn_pad, Ue_pad, Uc_pad),
        out_shape=jax.ShapeDtypeStruct((1, total), jnp.float32),
        in_specs=[smem, vmem, vmem, vmem, vmem, vmem],
        out_specs=vmem,
        compiler_params=pltpu.CompilerParams(vmem_limit_bytes=64 * 1024 * 1024),
    )(margin, ent_idx, con_idx, entT, chT, ctT)

    o1 = B_pad
    o2 = o1 + Bn_pad
    o3 = o2 + Ue_pad
    o4 = o3 + Uc_pad
    row = out[0]
    return (row[0:B],            # bE2CMemberL
            row[o1:o1 + Bn],     # bE2CDiscMemberL
            row[o2:o2 + Ue],     # uniqENormL
            row[o3:o3 + Uc],     # uniqBCBasisAlignL
            row[o4:o4 + Uc])     # uniqBCBasisCountL


reason_e_forward_jit = jax.jit(reason_e_forward)


def reason_e_forward_ref(params, aBHE, aBTE, aBC, nABHE, nABTE, nABC,
                         uniqE, uniqBC, lossMargin):
    """Pure-JAX reference mirroring the PyTorch forward, for verification."""
    entity_w, bch_w, bct_w = params
    g = lambda w, idx: jnp.take(w, idx, axis=0)
    aBHEE, aBTEE = g(entity_w, aBHE), g(entity_w, aBTE)
    aBCHE, aBCTE = g(bch_w, aBC), g(bct_w, aBC)
    nABHEE, nABTEE = g(entity_w, nABHE), g(entity_w, nABTE)
    nABCHE, nABCTE = g(bch_w, nABC), g(bct_w, nABC)
    uniqEE = g(entity_w, uniqE)
    uniqBCHE, uniqBCTE = g(bch_w, uniqBC), g(bct_w, uniqBC)

    h = (1.0 - aBCHE) * aBHEE
    t = (1.0 - aBCTE) * aBTEE
    memberL = jnp.sum(h * h, 1) + jnp.sum(t * t, 1)
    nh = (1.0 - nABCHE) * nABHEE
    nt = (1.0 - nABCTE) * nABTEE
    nl = jnp.sum(nh * nh, 1) + jnp.sum(nt * nt, 1)
    discL = jnp.maximum(lossMargin - nl, 0.0)
    te = jnp.sum(uniqEE * uniqEE, 1) - 1.0
    eNormL = te * te
    th = uniqBCHE * (1.0 - uniqBCHE)
    tt = uniqBCTE * (1.0 - uniqBCTE)
    alignL = jnp.sum(th * th, 1) + jnp.sum(tt * tt, 1)
    countL = (jnp.maximum(1.0 - jnp.sum(jnp.abs(uniqBCHE), 1), 0.0)
              + jnp.maximum(1.0 - jnp.sum(jnp.abs(uniqBCTE), 1), 0.0))
    return memberL, discL, eNormL, alignL, countL


if __name__ == "__main__":
    # Small, deterministic problem sizes.
    entityCount = 40
    uConceptCount = 6      # unused by forward (no uConcept embedding in __init__)
    bConceptCount = 12
    embedDim = 32
    B, Bn, Ue, Uc = 8, 8, 10, 6
    lossMargin = 1.0

    key = jax.random.PRNGKey(0)
    kp, k1, k2, k3, k4, k5, k6, k7, k8 = jax.random.split(key, 9)

    params = init_params(kp, entityCount, bConceptCount, embedDim)
    prep = prepare_params(params)   # one-time: transposed bf16-plane tables

    aBHE = jax.random.randint(k1, (B,), 0, entityCount, jnp.int32)
    aBTE = jax.random.randint(k2, (B,), 0, entityCount, jnp.int32)
    aBC = jax.random.randint(k3, (B,), 0, bConceptCount, jnp.int32)
    nABHE = jax.random.randint(k4, (Bn,), 0, entityCount, jnp.int32)
    nABTE = jax.random.randint(k5, (Bn,), 0, entityCount, jnp.int32)
    nABC = jax.random.randint(k6, (Bn,), 0, bConceptCount, jnp.int32)
    uniqE = jax.random.randint(k7, (Ue,), 0, entityCount, jnp.int32)
    uniqBC = jax.random.randint(k8, (Uc,), 0, bConceptCount, jnp.int32)

    # Pass margin as a device scalar so distinct margins do NOT retrace/recompile.
    margin_arr = jnp.float32(lossMargin)

    outs = reason_e_forward_jit(prep, aBHE, aBTE, aBC, nABHE, nABTE, nABC,
                                uniqE, uniqBC, margin_arr)
    outs = jax.block_until_ready(outs)

    refs = reason_e_forward_ref(params, aBHE, aBTE, aBC, nABHE, nABTE, nABC,
                                uniqE, uniqBC, lossMargin)
    for o, r in zip(outs, refs):
        assert o.shape == r.shape, (o.shape, r.shape)
        assert jnp.allclose(o, r, atol=1e-5, rtol=1e-5), (o, r)

    print("KERNEL_OK")
</pallas_src>

<mosaic_0001>
module attributes {stable_mosaic.version = 11 : i64} {
  func.func @reason_e_kernel(%arg0: memref<1xf32, #tpu.memory_space<smem>>, %arg1: memref<1x640xi32, #tpu.memory_space<vmem>>, %arg2: memref<1x384xi32, #tpu.memory_space<vmem>>, %arg3: memref<3x32x128xbf16, #tpu.memory_space<vmem>>, %arg4: memref<3x32x128xbf16, #tpu.memory_space<vmem>>, %arg5: memref<3x32x128xbf16, #tpu.memory_space<vmem>>, %arg6: memref<1x640xf32, #tpu.memory_space<vmem>>) attributes {dimension_semantics = [], scalar_prefetch = 0 : i64, scratch_operands = 0 : i64, tpu.core_type = #tpu.core_type<tc>} {
    %c0 = arith.constant 0 : index
    %0 = memref.load %arg0[%c0] : memref<1xf32, #tpu.memory_space<smem>>
    %1 = tpu.iota {dimensions = array<i32: 0>} : vector<128x640xi32>
    %c0_0 = arith.constant 0 : index
    %c0_1 = arith.constant 0 : index
    %2 = vector.load %arg1[%c0_0, %c0_1] : memref<1x640xi32, #tpu.memory_space<vmem>>, vector<1x640xi32>
    %3 = vector.broadcast %2 : vector<1x640xi32> to vector<128x640xi32>
    %4 = arith.cmpi eq, %1, %3 : vector<128x640xi32>
    %cst = arith.constant 1.000000e+00 : f32
    %cst_2 = arith.constant 0.000000e+00 : f32
    %5 = vector.broadcast %cst : f32 to vector<128x640xf32>
    %6 = vector.broadcast %cst_2 : f32 to vector<128x640xf32>
    %7 = arith.select %4, %5, %6 : vector<128x640xi1>, vector<128x640xf32>
    %8 = arith.truncf %7 : vector<128x640xf32> to vector<128x640xbf16>
    %9 = tpu.iota {dimensions = array<i32: 0>} : vector<128x384xi32>
    %c0_3 = arith.constant 0 : index
    %c0_4 = arith.constant 0 : index
    %10 = vector.load %arg2[%c0_3, %c0_4] : memref<1x384xi32, #tpu.memory_space<vmem>>, vector<1x384xi32>
    %11 = vector.broadcast %10 : vector<1x384xi32> to vector<128x384xi32>
    %12 = arith.cmpi eq, %9, %11 : vector<128x384xi32>
    %cst_5 = arith.constant 1.000000e+00 : f32
    %cst_6 = arith.constant 0.000000e+00 : f32
    %13 = vector.broadcast %cst_5 : f32 to vector<128x384xf32>
    %14 = vector.broadcast %cst_6 : f32 to vector<128x384xf32>
    %15 = arith.select %12, %13, %14 : vector<128x384xi1>, vector<128x384xf32>
    %16 = arith.truncf %15 : vector<128x384xf32> to vector<128x384xbf16>
    %c0_7 = arith.constant 0 : index
    %c0_8 = arith.constant 0 : index
    %c0_9 = arith.constant 0 : index
    %17 = vector.load %arg3[%c0_7, %c0_8, %c0_9] : memref<3x32x128xbf16, #tpu.memory_space<vmem>>, vector<1x32x128xbf16>
    %18 = vector.shape_cast %17 : vector<1x32x128xbf16> to vector<32x128xbf16>
    %cst_10 = arith.constant dense<0.000000e+00> : vector<32x640xf32>
    %19 = tpu.matmul %18, %8, %cst_10 {dimension_numbers = #tpu.dot_dimension_numbers<[1], [0], [0], [1], [0, 0, 1, 1], [], []>} : vector<32x128xbf16>, vector<128x640xbf16>, vector<32x640xf32> -> vector<32x640xf32>
    %c1 = arith.constant 1 : index
    %c0_11 = arith.constant 0 : index
    %c0_12 = arith.constant 0 : index
    %20 = vector.load %arg3[%c1, %c0_11, %c0_12] : memref<3x32x128xbf16, #tpu.memory_space<vmem>>, vector<1x32x128xbf16>
    %21 = vector.shape_cast %20 : vector<1x32x128xbf16> to vector<32x128xbf16>
    %cst_13 = arith.constant dense<0.000000e+00> : vector<32x640xf32>
    %22 = tpu.matmul %21, %8, %cst_13 {dimension_numbers = #tpu.dot_dimension_numbers<[1], [0], [0], [1], [0, 0, 1, 1], [], []>} : vector<32x128xbf16>, vector<128x640xbf16>, vector<32x640xf32> -> vector<32x640xf32>
    %23 = arith.addf %19, %22 : vector<32x640xf32>
    %c2 = arith.constant 2 : index
    %c0_14 = arith.constant 0 : index
    %c0_15 = arith.constant 0 : index
    %24 = vector.load %arg3[%c2, %c0_14, %c0_15] : memref<3x32x128xbf16, #tpu.memory_space<vmem>>, vector<1x32x128xbf16>
    %25 = vector.shape_cast %24 : vector<1x32x128xbf16> to vector<32x128xbf16>
    %cst_16 = arith.constant dense<0.000000e+00> : vector<32x640xf32>
    %26 = tpu.matmul %25, %8, %cst_16 {dimension_numbers = #tpu.dot_dimension_numbers<[1], [0], [0], [1], [0, 0, 1, 1], [], []>} : vector<32x128xbf16>, vector<128x640xbf16>, vector<32x640xf32> -> vector<32x640xf32>
    %27 = arith.addf %23, %26 : vector<32x640xf32>
    %c0_17 = arith.constant 0 : index
    %c0_18 = arith.constant 0 : index
    %c0_19 = arith.constant 0 : index
    %28 = vector.load %arg4[%c0_17, %c0_18, %c0_19] : memref<3x32x128xbf16, #tpu.memory_space<vmem>>, vector<1x32x128xbf16>
    %29 = vector.shape_cast %28 : vector<1x32x128xbf16> to vector<32x128xbf16>
    %cst_20 = arith.constant dense<0.000000e+00> : vector<32x384xf32>
    %30 = tpu.matmul %29, %16, %cst_20 {dimension_numbers = #tpu.dot_dimension_numbers<[1], [0], [0], [1], [0, 0, 1, 1], [], []>} : vector<32x128xbf16>, vector<128x384xbf16>, vector<32x384xf32> -> vector<32x384xf32>
    %c1_21 = arith.constant 1 : index
    %c0_22 = arith.constant 0 : index
    %c0_23 = arith.constant 0 : index
    %31 = vector.load %arg4[%c1_21, %c0_22, %c0_23] : memref<3x32x128xbf16, #tpu.memory_space<vmem>>, vector<1x32x128xbf16>
    %32 = vector.shape_cast %31 : vector<1x32x128xbf16> to vector<32x128xbf16>
    %cst_24 = arith.constant dense<0.000000e+00> : vector<32x384xf32>
    %33 = tpu.matmul %32, %16, %cst_24 {dimension_numbers = #tpu.dot_dimension_numbers<[1], [0], [0], [1], [0, 0, 1, 1], [], []>} : vector<32x128xbf16>, vector<128x384xbf16>, vector<32x384xf32> -> vector<32x384xf32>
    %34 = arith.addf %30, %33 : vector<32x384xf32>
    %c2_25 = arith.constant 2 : index
    %c0_26 = arith.constant 0 : index
    %c0_27 = arith.constant 0 : index
    %35 = vector.load %arg4[%c2_25, %c0_26, %c0_27] : memref<3x32x128xbf16, #tpu.memory_space<vmem>>, vector<1x32x128xbf16>
    %36 = vector.shape_cast %35 : vector<1x32x128xbf16> to vector<32x128xbf16>
    %cst_28 = arith.constant dense<0.000000e+00> : vector<32x384xf32>
    %37 = tpu.matmul %36, %16, %cst_28 {dimension_numbers = #tpu.dot_dimension_numbers<[1], [0], [0], [1], [0, 0, 1, 1], [], []>} : vector<32x128xbf16>, vector<128x384xbf16>, vector<32x384xf32> -> vector<32x384xf32>
    %38 = arith.addf %34, %37 : vector<32x384xf32>
    %c0_29 = arith.constant 0 : index
    %c0_30 = arith.constant 0 : index
    %c0_31 = arith.constant 0 : index
    %39 = vector.load %arg5[%c0_29, %c0_30, %c0_31] : memref<3x32x128xbf16, #tpu.memory_space<vmem>>, vector<1x32x128xbf16>
    %40 = vector.shape_cast %39 : vector<1x32x128xbf16> to vector<32x128xbf16>
    %cst_32 = arith.constant dense<0.000000e+00> : vector<32x384xf32>
    %41 = tpu.matmul %40, %16, %cst_32 {dimension_numbers = #tpu.dot_dimension_numbers<[1], [0], [0], [1], [0, 0, 1, 1], [], []>} : vector<32x128xbf16>, vector<128x384xbf16>, vector<32x384xf32> -> vector<32x384xf32>
    %c1_33 = arith.constant 1 : index
    %c0_34 = arith.constant 0 : index
    %c0_35 = arith.constant 0 : index
    %42 = vector.load %arg5[%c1_33, %c0_34, %c0_35] : memref<3x32x128xbf16, #tpu.memory_space<vmem>>, vector<1x32x128xbf16>
    %43 = vector.shape_cast %42 : vector<1x32x128xbf16> to vector<32x128xbf16>
    %cst_36 = arith.constant dense<0.000000e+00> : vector<32x384xf32>
    %44 = tpu.matmul %43, %16, %cst_36 {dimension_numbers = #tpu.dot_dimension_numbers<[1], [0], [0], [1], [0, 0, 1, 1], [], []>} : vector<32x128xbf16>, vector<128x384xbf16>, vector<32x384xf32> -> vector<32x384xf32>
    %45 = arith.addf %41, %44 : vector<32x384xf32>
    %c2_37 = arith.constant 2 : index
    %c0_38 = arith.constant 0 : index
    %c0_39 = arith.constant 0 : index
    %46 = vector.load %arg5[%c2_37, %c0_38, %c0_39] : memref<3x32x128xbf16, #tpu.memory_space<vmem>>, vector<1x32x128xbf16>
    %47 = vector.shape_cast %46 : vector<1x32x128xbf16> to vector<32x128xbf16>
    %cst_40 = arith.constant dense<0.000000e+00> : vector<32x384xf32>
    %48 = tpu.matmul %47, %16, %cst_40 {dimension_numbers = #tpu.dot_dimension_numbers<[1], [0], [0], [1], [0, 0, 1, 1], [], []>} : vector<32x128xbf16>, vector<128x384xbf16>, vector<32x384xf32> -> vector<32x384xf32>
    %49 = arith.addf %45, %48 : vector<32x384xf32>
    %50 = vector.extract_strided_slice %27 {offsets = [0, 0], sizes = [32, 256], strides = [1, 1]} : vector<32x640xf32> to vector<32x256xf32>
    %51 = vector.extract_strided_slice %27 {offsets = [0, 256], sizes = [32, 256], strides = [1, 1]} : vector<32x640xf32> to vector<32x256xf32>
    %52 = vector.extract_strided_slice %27 {offsets = [0, 512], sizes = [32, 128], strides = [1, 1]} : vector<32x640xf32> to vector<32x128xf32>
    %53 = vector.extract_strided_slice %38 {offsets = [0, 0], sizes = [32, 256], strides = [1, 1]} : vector<32x384xf32> to vector<32x256xf32>
    %54 = vector.extract_strided_slice %49 {offsets = [0, 0], sizes = [32, 256], strides = [1, 1]} : vector<32x384xf32> to vector<32x256xf32>
    %55 = vector.extract_strided_slice %38 {offsets = [0, 256], sizes = [32, 128], strides = [1, 1]} : vector<32x384xf32> to vector<32x128xf32>
    %56 = vector.extract_strided_slice %49 {offsets = [0, 256], sizes = [32, 128], strides = [1, 1]} : vector<32x384xf32> to vector<32x128xf32>
    %cst_41 = arith.constant 1.000000e+00 : f32
    %57 = vector.broadcast %cst_41 : f32 to vector<32x256xf32>
    %58 = arith.subf %57, %53 : vector<32x256xf32>
    %59 = arith.mulf %58, %50 : vector<32x256xf32>
    %cst_42 = arith.constant 1.000000e+00 : f32
    %60 = vector.broadcast %cst_42 : f32 to vector<32x256xf32>
    %61 = arith.subf %60, %54 : vector<32x256xf32>
    %62 = arith.mulf %61, %51 : vector<32x256xf32>
    %63 = arith.mulf %59, %59 : vector<32x256xf32>
    %cst_43 = arith.constant dense<0.000000e+00> : vector<256xf32>
    %64 = vector.multi_reduction <add>, %63, %cst_43 [0] : vector<32x256xf32> to vector<256xf32>
    %65 = vector.shape_cast %64 : vector<256xf32> to vector<1x256xf32>
    %66 = arith.mulf %62, %62 : vector<32x256xf32>
    %cst_44 = arith.constant dense<0.000000e+00> : vector<256xf32>
    %67 = vector.multi_reduction <add>, %66, %cst_44 [0] : vector<32x256xf32> to vector<256xf32>
    %68 = vector.shape_cast %67 : vector<256xf32> to vector<1x256xf32>
    %69 = arith.addf %65, %68 : vector<1x256xf32>
    %70 = vector.extract_strided_slice %69 {offsets = [0, 0], sizes = [1, 128], strides = [1, 1]} : vector<1x256xf32> to vector<1x128xf32>
    %71 = vector.extract_strided_slice %69 {offsets = [0, 128], sizes = [1, 128], strides = [1, 1]} : vector<1x256xf32> to vector<1x128xf32>
    %72 = vector.broadcast %0 : f32 to vector<1x128xf32>
    %73 = arith.subf %72, %71 : vector<1x128xf32>
    %cst_45 = arith.constant 0.000000e+00 : f32
    %74 = vector.broadcast %cst_45 : f32 to vector<1x128xf32>
    %75 = arith.maximumf %73, %74 : vector<1x128xf32>
    %76 = arith.mulf %52, %52 : vector<32x128xf32>
    %cst_46 = arith.constant dense<0.000000e+00> : vector<128xf32>
    %77 = vector.multi_reduction <add>, %76, %cst_46 [0] : vector<32x128xf32> to vector<128xf32>
    %78 = vector.shape_cast %77 : vector<128xf32> to vector<1x128xf32>
    %cst_47 = arith.constant 1.000000e+00 : f32
    %79 = vector.broadcast %cst_47 : f32 to vector<1x128xf32>
    %80 = arith.subf %78, %79 : vector<1x128xf32>
    %81 = arith.mulf %80, %80 : vector<1x128xf32>
    %cst_48 = arith.constant 1.000000e+00 : f32
    %82 = vector.broadcast %cst_48 : f32 to vector<32x128xf32>
    %83 = arith.subf %82, %55 : vector<32x128xf32>
    %84 = arith.mulf %55, %83 : vector<32x128xf32>
    %cst_49 = arith.constant 1.000000e+00 : f32
    %85 = vector.broadcast %cst_49 : f32 to vector<32x128xf32>
    %86 = arith.subf %85, %56 : vector<32x128xf32>
    %87 = arith.mulf %56, %86 : vector<32x128xf32>
    %88 = arith.mulf %84, %84 : vector<32x128xf32>
    %cst_50 = arith.constant dense<0.000000e+00> : vector<128xf32>
    %89 = vector.multi_reduction <add>, %88, %cst_50 [0] : vector<32x128xf32> to vector<128xf32>
    %90 = vector.shape_cast %89 : vector<128xf32> to vector<1x128xf32>
    %91 = arith.mulf %87, %87 : vector<32x128xf32>
    %cst_51 = arith.constant dense<0.000000e+00> : vector<128xf32>
    %92 = vector.multi_reduction <add>, %91, %cst_51 [0] : vector<32x128xf32> to vector<128xf32>
    %93 = vector.shape_cast %92 : vector<128xf32> to vector<1x128xf32>
    %94 = arith.addf %90, %93 : vector<1x128xf32>
    %95 = math.absf %55 : vector<32x128xf32>
    %cst_52 = arith.constant dense<0.000000e+00> : vector<128xf32>
    %96 = vector.multi_reduction <add>, %95, %cst_52 [0] : vector<32x128xf32> to vector<128xf32>
    %97 = vector.shape_cast %96 : vector<128xf32> to vector<1x128xf32>
    %cst_53 = arith.constant 1.000000e+00 : f32
    %98 = vector.broadcast %cst_53 : f32 to vector<1x128xf32>
    %99 = arith.subf %98, %97 : vector<1x128xf32>
    %cst_54 = arith.constant 0.000000e+00 : f32
    %100 = vector.broadcast %cst_54 : f32 to vector<1x128xf32>
    %101 = arith.maximumf %99, %100 : vector<1x128xf32>
    %102 = math.absf %56 : vector<32x128xf32>
    %cst_55 = arith.constant dense<0.000000e+00> : vector<128xf32>
    %103 = vector.multi_reduction <add>, %102, %cst_55 [0] : vector<32x128xf32> to vector<128xf32>
    %104 = vector.shape_cast %103 : vector<128xf32> to vector<1x128xf32>
    %cst_56 = arith.constant 1.000000e+00 : f32
    %105 = vector.broadcast %cst_56 : f32 to vector<1x128xf32>
    %106 = arith.subf %105, %104 : vector<1x128xf32>
    %cst_57 = arith.constant 0.000000e+00 : f32
    %107 = vector.broadcast %cst_57 : f32 to vector<1x128xf32>
    %108 = arith.maximumf %106, %107 : vector<1x128xf32>
    %109 = arith.addf %101, %108 : vector<1x128xf32>
    %c0_58 = arith.constant 0 : index
    %c0_59 = arith.constant 0 : index
    %110 = vector.load %arg6[%c0_58, %c0_59] : memref<1x640xf32, #tpu.memory_space<vmem>>, vector<1x128xf32>
    tpu.vector_store %arg6[%c0_58, %c0_59], %70 {strides = array<i32>} : memref<1x640xf32, #tpu.memory_space<vmem>>, vector<1x128xf32>,
    %c0_60 = arith.constant 0 : index
    %c128 = arith.constant 128 : index
    %111 = vector.load %arg6[%c0_60, %c128] : memref<1x640xf32, #tpu.memory_space<vmem>>, vector<1x128xf32>
    tpu.vector_store %arg6[%c0_60, %c128], %75 {strides = array<i32>} : memref<1x640xf32, #tpu.memory_space<vmem>>, vector<1x128xf32>,
    %c0_61 = arith.constant 0 : index
    %c256 = arith.constant 256 : index
    %112 = vector.load %arg6[%c0_61, %c256] : memref<1x640xf32, #tpu.memory_space<vmem>>, vector<1x128xf32>
    tpu.vector_store %arg6[%c0_61, %c256], %81 {strides = array<i32>} : memref<1x640xf32, #tpu.memory_space<vmem>>, vector<1x128xf32>,
    %c0_62 = arith.constant 0 : index
    %c384 = arith.constant 384 : index
    %113 = vector.load %arg6[%c0_62, %c384] : memref<1x640xf32, #tpu.memory_space<vmem>>, vector<1x128xf32>
    tpu.vector_store %arg6[%c0_62, %c384], %94 {strides = array<i32>} : memref<1x640xf32, #tpu.memory_space<vmem>>, vector<1x128xf32>,
    %c0_63 = arith.constant 0 : index
    %c512 = arith.constant 512 : index
    %114 = vector.load %arg6[%c0_63, %c512] : memref<1x640xf32, #tpu.memory_space<vmem>>, vector<1x128xf32>
    tpu.vector_store %arg6[%c0_63, %c512], %109 {strides = array<i32>} : memref<1x640xf32, #tpu.memory_space<vmem>>, vector<1x128xf32>,
    return
  }
}

</mosaic_0001>

<bundles_post_ra>
// kernel: custom-call
= control target key start
LH: loop header
LB: loop body
LE: loop exit
PB: predicated region body
PF: predicated region fallthrough
CT: control target
= control target key end

     0   :  { %s6_s0 = inlined_call_operand.vmem [shape: s32[640], index: 0, kind: output, shape index: {}]  }

// kernel: reason_e_forward.1
= control target key start
LH: loop header
LB: loop body
LE: loop exit
PB: predicated region body
PF: predicated region fallthrough
CT: control target
= control target key end

     0   :  { %12 = vsyncpa [#allocation4], 0  ;;  %s4963_s0 = inlined_call_operand.<no memory space> [shape: f32[1], index: 0, kind: input, shape index: {}]   ;;  %s4964_s1 = inlined_call_operand.vmem [shape: s32[1,640], index: 1, kind: input, shape index: {}]   ;;  %s4965_s2 = inlined_call_operand.vmem [shape: s32[1,384], index: 2, kind: input, shape index: {}]   ;;  %s4966_s3 = inlined_call_operand.hbm [shape: bf16[3,32,128], index: 3, kind: input, shape index: {}]   ;;  %s4967_s4 = inlined_call_operand.hbm [shape: bf16[3,32,128], index: 4, kind: input, shape index: {}]   ;;  %s4968_s5 = inlined_call_operand.hbm [shape: bf16[3,32,128], index: 5, kind: input, shape index: {}]   ;;  %s4969_s6 = inlined_call_operand.vmem [shape: f32[1,640], index: 6, kind: output, shape index: {}]  }
   0x1   :  { %13 = vsyncpa [#allocation6], 0  ;;  %s2808_s21 = smov [#allocation5]   ;;  %s2809_s23 = smov [#allocation3]  }
   0x2   :  { %s37_s22 = sshll.u32 %s2808_s21, 4  ;;  %s25_s24 = sshll.u32 %s2809_s23, 4  ;;  %s38_s22 = int_to_ptr.vmem [resolvable:$true] %s37_s22  ;;  %s26_s24 = int_to_ptr.vmem [resolvable:$true] %s25_s24 }
   0x3   :  { %s2752_s25 = scalar_lea.vmem %s38_s22, 768  ;;  %p2757_p1 = scmp.lt.s32.totalorder %s38_s22, %s38_s22 }
   0x4   :  { %p2753_p0 = scmp.ne.s32.totalorder %s38_s22, %s2752_s25  ;;  %p2758_p2 = scmp.lt.s32.totalorder %s2752_s25, %s2752_s25 }
   0x6   :  { %p2759_p3 = por %p2758_p2, %p2757_p1 }
   0x8   :  { %p2760_p4 = pnand %p2759_p3, %p2753_p0 }
   0xa   :  { %2763 = shalt.err (!%p2760_p4)
}
   0xb   :  { %s2810_s26 = smov 64   ;;  %s2811_s27 = smov 4  }
   0xc   :  { %43 = dma.hbm_to_vmem [thread:$0]  %s4967_s4, 768, %s38_s22, [#allocation6], %s2810_s26, %s2810_s26, %s2811_s27  }
   0xd   :  { %s2772_s30 = scalar_lea.vmem %s26_s24, 768  ;;  %p2777_p6 = scmp.lt.s32.totalorder %s26_s24, %s26_s24 }
   0xe   :  { %p2773_p5 = scmp.ne.s32.totalorder %s26_s24, %s2772_s30  ;;  %p2778_p7 = scmp.lt.s32.totalorder %s2772_s30, %s2772_s30 }
  0x10   :  { %p2779_p8 = por %p2778_p7, %p2777_p6 }
  0x12   :  { %p2780_p9 = pnand %p2779_p8, %p2773_p5 }
  0x14   :  { %2783 = shalt.err (!%p2780_p9)
}
  0x15   :  { %31 = dma.hbm_to_vmem [thread:$0]  %s4966_s3, 768, %s26_s24, [#allocation4], %s2810_s26, %s2810_s26, %s2811_s27  }
  0x16   :  { %s2812_s9 = smov [#allocation7]  }
  0x17   :  { %s49_s10 = sshll.u32 %s2812_s9, 4  ;;  %s50_s10 = int_to_ptr.vmem [resolvable:$true] %s49_s10 }
  0x18   :  { %s2792_s11 = scalar_lea.vmem %s50_s10, 768  ;;  %p2797_p11 = scmp.lt.s32.totalorder %s50_s10, %s50_s10 }
  0x19   :  { %p2793_p10 = scmp.ne.s32.totalorder %s50_s10, %s2792_s11  ;;  %p2798_p12 = scmp.lt.s32.totalorder %s2792_s11, %s2792_s11 }
  0x1b   :  { %p2799_p13 = por %p2798_p12, %p2797_p11 }
  0x1d   :  { %p2800_p0 = pnand %p2799_p13, %p2793_p10 }
  0x1f   :  { %2803 = shalt.err (!%p2800_p0)
}
  0x20   :  { %55 = dma.hbm_to_vmem [thread:$0]  %s4968_s5, 768, %s50_s10, [#allocation6], %s2810_s26, %s2810_s26, %s2811_s27  }
  0x21   :  { %2804 = dma.done.wait [#allocation4], 768  }
  0x22   :  { %2805 = vsyncadd [#allocation4], 4294966528 }
  0x23   :  { %2806 = dma.done.wait [#allocation6], 1536  }
  0x24   :  { %2807 = vsyncadd [#allocation6], 4294965760  ;;  %v5025_v0 = vlaneseq  ;;  %v5027_v1 = vmov 0   ;;  %v2877_v9 = vld [vmem:[%s4964_s1] sm:$0x1f]  ;;  %v5130_v16 = vmov 0 }
  0x25   :  { %491 = vmatprep.mubr.bf16.mxu0 %v5027_v1  ;;  %544 = vmatprep.mubr.bf16.mxu1 %v5027_v1  ;;  %v5042_v17 = vmov 1.0|1.0   ;;  %v5132_v18 = vmov 0  ;;  %v5134_v21 = vmov 0  ;;  %v5136_v22 = vmov 0 }
  0x26   :  { %v2862_v2 = vshrl.u32 %v5025_v0, 7  ;;  %v2961_v23 = vld [vmem:[%s4965_s2] sm:$0x7]  ;;  %v5138_v24 = vmov 0  ;;  %v5140_v25 = vmov 0  ;;  %v5142_v28 = vmov 0 }
  0x27   :  { %v5144_v29 = vmov 0  ;;  %v5146_v30 = vmov 0  ;;  %v5149_v35 = vmov 0  ;;  %v5151_v36 = vmov 0 }
  0x28   :  { %v91_v3 = vsub.s32 1, %v2862_v2  ;;  %v99_v4 = vsub.s32 3, %v2862_v2  ;;  %v87_v5 = vsub.s32 0, %v2862_v2  ;;  %v95_v6 = vsub.s32 2, %v2862_v2 }
  0x29   :  { %v2869_v7 = vadd.s32 112, %v2862_v2  ;;  %v2872_v8 = vadd.s32 120, %v2862_v2  ;;  %v2880_v10 = vadd.s32 96, %v2862_v2  ;;  %v2892_v14 = vadd.s32 104, %v2862_v2 }
  0x2a   :  { %v2883_v11 = vrot.slane %v2877_v9, %v91_v3  ;;  %v2886_v12 = vrot.slane %v2877_v9, %v99_v4  ;;  %v2889_v13 = vrot.slane %v2877_v9, %v87_v5  ;;  %v2897_v15 = vrot.slane %v2877_v9, %v95_v6  ;;  %v2726_v4 = vld [vmem:[#allocation3 + $0x10] sm:$0xff]  }
  0x2b   :  { %v2931_v19 = vadd.s32 80, %v2862_v2  ;;  %v2934_v20 = vadd.s32 88, %v2862_v2  ;;  %v2986_v26 = vadd.s32 64, %v2862_v2  ;;  %v2989_v27 = vadd.s32 72, %v2862_v2 }
  0x2c   :  { %vm176_vm0 = vcmp.eq.s32.totalorder %v2869_v7, %v2883_v11  ;;  %vm181_vm1 = vcmp.eq.s32.totalorder %v2872_v8, %v2883_v11  ;;  %vm178_vm2 = vcmp.eq.s32.totalorder %v2869_v7, %v2886_v12  ;;  %vm183_vm3 = vcmp.eq.s32.totalorder %v2872_v8, %v2886_v12 }
  0x2d   :  { %vm2907_vm4 = vmpackc.low %vm181_vm1, %vm176_vm0  ;;  %vm175_vm5 = vcmp.eq.s32.totalorder %v2869_v7, %v2889_v13  ;;  %vm180_vm6 = vcmp.eq.s32.totalorder %v2872_v8, %v2889_v13  ;;  %vm177_vm7 = vcmp.eq.s32.totalorder %v2869_v7, %v2897_v15  ;;  %vm182_vm8 = vcmp.eq.s32.totalorder %v2872_v8, %v2897_v15 }
  0x2e   :  { %v5131_v16 = vsel %vm2907_vm4, 4294967295, %v5130_v16  ;;  %1905 = vmatprep.subr.msk.bf16.mxu0 %vm2907_vm4, %v5042_v17  ;;  %vm2922_vm9 = vmpackc.low %vm183_vm3, %vm178_vm2  ;;  %vm166_vm10 = vcmp.eq.s32.totalorder %v2880_v10, %v2883_v11  ;;  %vm171_vm11 = vcmp.eq.s32.totalorder %v2892_v14, %v2883_v11  ;;  %vm168_vm13 = vcmp.eq.s32.totalorder %v2880_v10, %v2886_v12 }
  0x2f   :  { %v5133_v18 = vsel %vm2922_vm9, 4294967295, %v5132_v18  ;;  %1937 = vmatprep.subr.msk.bf16.mxu1 %vm2922_vm9, %v5042_v17  ;;  %vm2939_vm12 = vmpackc.low %vm180_vm6, %vm175_vm5  ;;  %vm173_vm14 = vcmp.eq.s32.totalorder %v2892_v14, %v2886_v12  ;;  %vm165_vm0 = vcmp.eq.s32.totalorder %v2880_v10, %v2889_v13  ;;  %vm170_vm1 = vcmp.eq.s32.totalorder %v2892_v14, %v2889_v13 }
  0x30   :  { %v5135_v21 = vsel %vm2939_vm12, 4294967295, %v5134_v21  ;;  %1907 = vmatpush1.bf16.msk.msra.mxu0 %vm2939_vm12, %v5042_v17  ;;  %vm2950_vm15 = vmpackc.low %vm182_vm8, %vm177_vm7  ;;  %vm167_vm3 = vcmp.eq.s32.totalorder %v2880_v10, %v2897_v15  ;;  %vm172_vm5 = vcmp.eq.s32.totalorder %v2892_v14, %v2897_v15  ;;  %vm156_vm7 = vcmp.eq.s32.totalorder %v2931_v19, %v2883_v11 }
  0x31   :  { %v5137_v22 = vsel %vm2950_vm15, 4294967295, %v5136_v22  ;;  %1939 = vmatpush1.bf16.msk.msra.mxu1 %vm2950_vm15, %v5042_v17  ;;  %vm2966_vm2 = vmpackc.low %vm171_vm11, %vm166_vm10  ;;  %vm161_vm8 = vcmp.eq.s32.totalorder %v2934_v20, %v2883_v11  ;;  %v3025_v31 = vadd.s32 48, %v2862_v2  ;;  %v3028_v32 = vadd.s32 56, %v2862_v2 }
  0x32   :  { %v5139_v24 = vsel %vm2966_vm2, 4294967295, %v5138_v24  ;;  %1909 = vmatprep.subr.msk.bf16.mxu0 %vm2966_vm2, %v5042_v17  ;;  %vm2977_vm6 = vmpackc.low %vm173_vm14, %vm168_vm13  ;;  %vm163_vm13 = vcmp.eq.s32.totalorder %v2934_v20, %v2886_v12  ;;  %v3031_v33 = vrot.slane %v2961_v23, %v91_v3  ;;  %v3034_v34 = vrot.slane %v2961_v23, %v87_v5 }
  0x33   :  { %v5141_v25 = vsel %vm2977_vm6, 4294967295, %v5140_v25  ;;  %1941 = vmatprep.subr.msk.bf16.mxu1 %vm2977_vm6, %v5042_v17  ;;  %vm2994_vm10 = vmpackc.low %vm170_vm1, %vm165_vm0  ;;  %vm155_vm0 = vcmp.eq.s32.totalorder %v2931_v19, %v2889_v13  ;;  %vm160_vm1 = vcmp.eq.s32.totalorder %v2934_v20, %v2889_v13  ;;  %v3067_v37 = vadd.s32 32, %v2862_v2 }
  0x34   :  { %v5143_v28 = vsel %vm2994_vm10, 4294967295, %v5142_v28  ;;  %1911 = vmatpush1.bf16.msk.msra.mxu0 %vm2994_vm10, %v5042_v17  ;;  %vm3005_vm14 = vmpackc.low %vm172_vm5, %vm167_vm3  ;;  %vm151_vm3 = vcmp.eq.s32.totalorder %v2989_v27, %v2883_v11  ;;  %v5155_v38 = vmov 0  ;;  %v3089_v39 = vadd.s32 40, %v2862_v2 }
  0x35   :  { %v5145_v29 = vsel %vm3005_vm14, 4294967295, %v5144_v29  ;;  %1943 = vmatpush1.bf16.msk.msra.mxu1 %vm3005_vm14, %v5042_v17  ;;  %vm3016_vm11 = vmpackc.low %vm161_vm8, %vm156_vm7  ;;  %vm5148_vm7 = vcmp.eq.s32.totalorder %v2931_v19, %v2886_v12  ;;  %v5158_v40 = vmov 0  ;;  %v5162_v41 = vmov 0 }
  0x36   :  { %v5147_v30 = vsel %vm3016_vm11, 4294967295, %v5146_v30  ;;  %1913 = vmatprep.subr.msk.bf16.mxu0 %vm3016_vm11, %v5042_v17  ;;  %vm3042_vm8 = vmpackc.low %vm163_vm13, %vm5148_vm7  ;;  %v5166_v42 = vmov 0  ;;  %v3150_v43 = vadd.s32 16, %v2862_v2  ;;  %v5170_v44 = vmov 0 }
  0x37   :  { %v5150_v35 = vsel %vm3042_vm8, 4294967295, %v5149_v35  ;;  %1945 = vmatprep.subr.msk.bf16.mxu1 %vm3042_vm8, %v5042_v17  ;;  %vm3056_vm14 = vmpackc.low %vm160_vm1, %vm155_vm0  ;;  %vm5153_vm0 = vcmp.eq.s32.totalorder %v2931_v19, %v2897_v15  ;;  %vm5154_vm1 = vcmp.eq.s32.totalorder %v2934_v20, %v2897_v15  ;;  %v3170_v45 = vadd.s32 24, %v2862_v2 }
  0x38   :  { %v5152_v36 = vsel %vm3056_vm14, 4294967295, %v5151_v36  ;;  %1915 = vmatpush1.bf16.msk.msra.mxu0 %vm3056_vm14, %v5042_v17  ;;  %vm3078_vm13 = vmpackc.low %vm5154_vm1, %vm5153_vm0  ;;  %vm5157_vm0 = vcmp.eq.s32.totalorder %v2986_v26, %v2883_v11  ;;  %v3173_v46 = vadd.s32 8, %v2862_v2  ;;  %v5174_v47 = vmov 0 }
  0x39   :  { %v5156_v38 = vsel %vm3078_vm13, 4294967295, %v5155_v38  ;;  %1947 = vmatpush1.bf16.msk.msra.mxu1 %vm3078_vm13, %v5042_v17  ;;  %vm3097_vm1 = vmpackc.low %vm151_vm3, %vm5157_vm0  ;;  %vm5160_vm3 = vcmp.eq.s32.totalorder %v2986_v26, %v2886_v12  ;;  %vm5161_vm0 = vcmp.eq.s32.totalorder %v2989_v27, %v2886_v12  ;;  %v5178_v48 = vmov 0 }
  0x3a   :  { %v5159_v40 = vsel %vm3097_vm1, 4294967295, %v5158_v40  ;;  %1917 = vmatprep.subr.msk.bf16.mxu0 %vm3097_vm1, %v5042_v17  ;;  %vm3118_vm7 = vmpackc.low %vm5161_vm0, %vm5160_vm3  ;;  %vm5164_vm3 = vcmp.eq.s32.totalorder %v2986_v26, %v2889_v13  ;;  %vm5165_vm0 = vcmp.eq.s32.totalorder %v2989_v27, %v2889_v13  ;;  %v5182_v49 = vmov 0 }
  0x3b   :  { %v5163_v41 = vsel %vm3118_vm7, 4294967295, %v5162_v41  ;;  %1949 = vmatprep.subr.msk.bf16.mxu1 %vm3118_vm7, %v5042_v17  ;;  %vm3139_vm5 = vmpackc.low %vm5165_vm0, %vm5164_vm3  ;;  %vm5168_vm3 = vcmp.eq.s32.totalorder %v2986_v26, %v2897_v15  ;;  %vm5169_vm0 = vcmp.eq.s32.totalorder %v2989_v27, %v2897_v15  ;;  %v103_v50 = vsub.s32 4, %v2862_v2 }
  0x3c   :  { %v5167_v42 = vsel %vm3139_vm5, 4294967295, %v5166_v42  ;;  %1919 = vmatpush1.bf16.msk.msra.mxu0 %vm3139_vm5, %v5042_v17  ;;  %vm3161_vm8 = vmpackc.low %vm5169_vm0, %vm5168_vm3  ;;  %vm5172_vm3 = vcmp.eq.s32.totalorder %v3025_v31, %v2883_v11  ;;  %vm5173_vm0 = vcmp.eq.s32.totalorder %v3028_v32, %v2883_v11  ;;  %v5186_v51 = vmov 0 }
  0x3d   :  { %v5171_v44 = vsel %vm3161_vm8, 4294967295, %v5170_v44  ;;  %1951 = vmatpush1.bf16.msk.msra.mxu1 %vm3161_vm8, %v5042_v17  ;;  %vm3184_vm6 = vmpackc.low %vm5173_vm0, %vm5172_vm3  ;;  %vm5176_vm3 = vcmp.eq.s32.totalorder %v3025_v31, %v2886_v12  ;;  %vm5177_vm0 = vcmp.eq.s32.totalorder %v3028_v32, %v2886_v12  ;;  %v5190_v52 = vmov 0 }
  0x3e   :  { %v5175_v47 = vsel %vm3184_vm6, 4294967295, %v5174_v47  ;;  %1921 = vmatprep.subr.msk.bf16.mxu0 %vm3184_vm6, %v5042_v17  ;;  %vm3205_vm13 = vmpackc.low %vm5177_vm0, %vm5176_vm3  ;;  %vm5180_vm3 = vcmp.eq.s32.totalorder %v3025_v31, %v2889_v13  ;;  %vm5181_vm0 = vcmp.eq.s32.totalorder %v3028_v32, %v2889_v13  ;;  %v5195_v53 = vmov 0 }
  0x3f   :  { %v5179_v48 = vsel %vm3205_vm13, 4294967295, %v5178_v48  ;;  %1953 = vmatprep.subr.msk.bf16.mxu1 %vm3205_vm13, %v5042_v17  ;;  %vm3226_vm15 = vmpackc.low %vm5181_vm0, %vm5180_vm3  ;;  %vm5184_vm3 = vcmp.eq.s32.totalorder %v3025_v31, %v2897_v15  ;;  %vm5185_vm0 = vcmp.eq.s32.totalorder %v3028_v32, %v2897_v15  ;;  %v5199_v54 = vmov 0 }
  0x40   :  { %v5183_v49 = vsel %vm3226_vm15, 4294967295, %v5182_v49  ;;  %1923 = vmatpush1.bf16.msk.msra.mxu0 %vm3226_vm15, %v5042_v17  ;;  %vm3246_vm13 = vmpackc.low %vm5185_vm0, %vm5184_vm3  ;;  %vm5188_vm3 = vcmp.eq.s32.totalorder %v3067_v37, %v2883_v11  ;;  %vm5189_vm0 = vcmp.eq.s32.totalorder %v3089_v39, %v2883_v11  ;;  %v5203_v55 = vmov 0 }
  0x41   :  { %v5187_v51 = vsel %vm3246_vm13, 4294967295, %v5186_v51  ;;  %1955 = vmatpush1.bf16.msk.msra.mxu1 %vm3246_vm13, %v5042_v17  ;;  %vm3267_vm9 = vmpackc.low %vm5189_vm0, %vm5188_vm3  ;;  %vm5193_vm13 = vcmp.eq.s32.totalorder %v3067_v37, %v2886_v12  ;;  %vm5194_vm3 = vcmp.eq.s32.totalorder %v3089_v39, %v2886_v12  ;;  %v3339_v56 = vrot.slane %v2877_v9, %v103_v50 }
  0x42   :  { %v5191_v52 = vsel %vm3267_vm9, 4294967295, %v5190_v52  ;;  %1925 = vmatprep.subr.msk.bf16.mxu0 %vm3267_vm9, %v5042_v17  ;;  %vm3286_vm0 = vmpackc.low %vm5194_vm3, %vm5193_vm13  ;;  %vm5197_vm13 = vcmp.eq.s32.totalorder %v3067_v37, %v2889_v13  ;;  %vm5198_vm3 = vcmp.eq.s32.totalorder %v3089_v39, %v2889_v13  ;;  %v5207_v57 = vmov 0 }
  0x43   :  { %5192 = vst [vmem:[#allocation10_spill] sm:$0xff] %v5191_v52  ;;  %v5196_v53 = vsel %vm3286_vm0, 4294967295, %v5195_v53  ;;  %1957 = vmatprep.subr.msk.bf16.mxu1 %vm3286_vm0, %v5042_v17  ;;  %vm3307_vm15 = vmpackc.low %vm5198_vm3, %vm5197_vm13  ;;  %vm5201_vm13 = vcmp.eq.s32.totalorder %v3067_v37, %v2897_v15  ;;  %vm5202_vm3 = vcmp.eq.s32.totalorder %v3089_v39, %v2897_v15  ;;  %v5211_v58 = vmov 0 }
  0x44   :  { %v5200_v54 = vsel %vm3307_vm15, 4294967295, %v5199_v54  ;;  %1927 = vmatpush1.bf16.msk.msra.mxu0 %vm3307_vm15, %v5042_v17  ;;  %vm3328_vm7 = vmpackc.low %vm5202_vm3, %vm5201_vm13  ;;  %vm5205_vm13 = vcmp.eq.s32.totalorder %v3150_v43, %v2883_v11  ;;  %vm5206_vm3 = vcmp.eq.s32.totalorder %v3170_v45, %v2883_v11  ;;  %v5215_v59 = vmov 0 }
  0x45   :  { %v5204_v55 = vsel %vm3328_vm7, 4294967295, %v5203_v55  ;;  %1959 = vmatpush1.bf16.msk.msra.mxu1 %vm3328_vm7, %v5042_v17  ;;  %vm3350_vm8 = vmpackc.low %vm5206_vm3, %vm5205_vm13  ;;  %vm5209_vm13 = vcmp.eq.s32.totalorder %v3150_v43, %v2886_v12  ;;  %vm5210_vm3 = vcmp.eq.s32.totalorder %v3170_v45, %v2886_v12  ;;  %v5219_v60 = vmov 0 }
  0x46   :  { %v5208_v57 = vsel %vm3350_vm8, 4294967295, %v5207_v57  ;;  %1929 = vmatprep.subr.msk.bf16.mxu0 %vm3350_vm8, %v5042_v17  ;;  %vm3371_vm9 = vmpackc.low %vm5210_vm3, %vm5209_vm13  ;;  %vm5213_vm13 = vcmp.eq.s32.totalorder %v3150_v43, %v2889_v13  ;;  %vm5214_vm3 = vcmp.eq.s32.totalorder %v3170_v45, %v2889_v13  ;;  %v5223_v61 = vmov 0 }
  0x47   :  { %v5212_v58 = vsel %vm3371_vm9, 4294967295, %v5211_v58  ;;  %1961 = vmatprep.subr.msk.bf16.mxu1 %vm3371_vm9, %v5042_v17  ;;  %vm3392_vm15 = vmpackc.low %vm5214_vm3, %vm5213_vm13  ;;  %vm5217_vm13 = vcmp.eq.s32.totalorder %v3150_v43, %v2897_v15  ;;  %vm5218_vm3 = vcmp.eq.s32.totalorder %v3170_v45, %v2897_v15  ;;  %vm110_vm9 = vcmp.eq.s32.totalorder %v3173_v46, %v2889_v13 }
  0x48   :  { %v5216_v59 = vsel %vm3392_vm15, 4294967295, %v5215_v59  ;;  %1931 = vmatpush1.bf16.msk.msra.mxu0 %vm3392_vm15, %v5042_v17  ;;  %vm3413_vm0 = vmpackc.low %vm5218_vm3, %vm5217_vm13  ;;  %vm5221_vm13 = vcmp.eq.s32.totalorder %v2862_v2, %v2883_v11  ;;  %vm5222_vm3 = vcmp.eq.s32.totalorder %v3173_v46, %v2883_v11  ;;  %vm112_vm15 = vcmp.eq.s32.totalorder %v3173_v46, %v2897_v15 }
  0x49   :  { %v5220_v60 = vsel %vm3413_vm0, 4294967295, %v5219_v60  ;;  %1963 = vmatpush1.bf16.msk.msra.mxu1 %vm3413_vm0, %v5042_v17  ;;  %vm3434_vm7 = vmpackc.low %vm5222_vm3, %vm5221_vm13  ;;  %v3447_v62 = vrot.slane %v2961_v23, %v95_v6  ;;  %vm5225_vm13 = vcmp.eq.s32.totalorder %v2862_v2, %v2886_v12  ;;  %vm5226_vm3 = vcmp.eq.s32.totalorder %v3173_v46, %v2886_v12 }
  0x4a   :  { %v5224_v61 = vsel %vm3434_vm7, 4294967295, %v5223_v61  ;;  %1933 = vmatprep.subr.msk.bf16.mxu0 %vm3434_vm7, %v5042_v17  ;;  %vm3458_vm8 = vmpackc.low %vm5226_vm3, %vm5225_vm13  ;;  %v5227_v63 = vmov 0  ;;  %vm179_vm6 = vcmp.eq.s32.totalorder %v2869_v7, %v3339_v56  ;;  %vm184_vm0 = vcmp.eq.s32.totalorder %v2872_v8, %v3339_v56 }
  0x4b   :  { %v5228_v63 = vsel %vm3458_vm8, 4294967295, %v5227_v63  ;;  %1965 = vmatprep.subr.msk.bf16.mxu1 %vm3458_vm8, %v5042_v17  ;;  %vm5229_vm7 = vcmp.eq.s32.totalorder %v2862_v2, %v2889_v13  ;;  %v5230_v3 = vmov 0  ;;  %vm169_vm13 = vcmp.eq.s32.totalorder %v2880_v10, %v3339_v56  ;;  %vm3495_vm8 = vmpackc.low %vm184_vm0, %vm179_vm6  ;;  %v3550_v13 = vld [vmem:[#allocation3 + $0x18] sm:$0xff]  }
  0x4c   :  { %vm3472_vm5 = vmpackc.low %vm110_vm9, %vm5229_vm7  ;;  %vm174_vm3 = vcmp.eq.s32.totalorder %v2892_v14, %v3339_v56  ;;  %vm5232_vm9 = vcmp.eq.s32.totalorder %v2862_v2, %v2897_v15  ;;  %v5233_v5 = vmov 0  ;;  %v5235_v6 = vmov 0 }
  0x4d   :  { %v5231_v3 = vsel %vm3472_vm5, 4294967295, %v5230_v3  ;;  %1935 = vmatpush1.bf16.msk.msra.mxu0 %vm3472_vm5, %v5042_v17  ;;  %vm3488_vm7 = vmpackc.low %vm112_vm15, %vm5232_vm9  ;;  %v5236_v6 = vsel %vm3495_vm8, 4294967295, %v5235_v6  ;;  %v5237_v9 = vmov 0  ;;  %vm159_vm0 = vcmp.eq.s32.totalorder %v2931_v19, %v3339_v56 }
  0x4e   :  { %v5234_v5 = vsel %vm3488_vm7, 4294967295, %v5233_v5  ;;  %1967 = vmatpush1.bf16.msk.msra.mxu1 %vm3488_vm7, %v5042_v17  ;;  %2539 = vmatprep.subr.msk.bf16.mxu0 %vm3495_vm8, %v5042_v17  ;;  %vm3505_vm15 = vmpackc.low %vm174_vm3, %vm169_vm13  ;;  %vm164_vm1 = vcmp.eq.s32.totalorder %v2934_v20, %v3339_v56  ;;  %vm149_vm13 = vcmp.eq.s32.totalorder %v2986_v26, %v3339_v56  ;;  %vm154_vm3 = vcmp.eq.s32.totalorder %v2989_v27, %v3339_v56 }
  0x4f   :  { %1987 = vmatprep.subr.msk.bf16.mxu1 %vm2907_vm4, %v5042_v17  ;;  %v5238_v9 = vsel %vm3505_vm15, 4294967295, %v5237_v9  ;;  %vm144_vm9 = vcmp.eq.s32.totalorder %v3028_v32, %v3339_v56  ;;  %vm3541_vm6 = vmpackc.low %vm164_vm1, %vm159_vm0  ;;  %v5239_v11 = vmov 0  ;;  %v5241_v12 = vmov 0 }
  0x50   :  { %492 = vmatmul.mubr.bf16.vlgmr.msra.gmra.mxu0 %v2726_v4  ;;  %v5240_v11 = vsel %vm3541_vm6, 4294967295, %v5239_v11  ;;  %vm129_vm4 = vcmp.eq.s32.totalorder %v3067_v37, %v3339_v56  ;;  %vm134_vm7 = vcmp.eq.s32.totalorder %v3089_v39, %v3339_v56  ;;  %vm5243_vm1 = vcmp.eq.s32.totalorder %v3025_v31, %v3339_v56 }
  0x51   :  { %545 = vmatmul.mubr.bf16.vlgmr.msra.gmra.mxu1 %v2726_v4  ;;  %2540 = vmatpush3.bf16.msk.msra.mxu0 %vm3495_vm8, %v5042_v17  ;;  %vm3563_vm0 = vmpackc.low %vm144_vm9, %vm5243_vm1  ;;  %v5244_v15 = vmov 0  ;;  %v5248_v23 = vmov 0  ;;  %v5251_v50 = vmov 0  ;;  %v5255_v0 = vmov 0 }
  0x52   :  { %1989 = vmatpush1.bf16.msk.msra.mxu1 %vm2939_vm12, %v5042_v17  ;;  %2541 = vmatprep.subr.msk.bf16.mxu0 %vm3505_vm15, %v5042_v17  ;;  %vm3546_vm12 = vmpackc.low %vm154_vm3, %vm149_vm13  ;;  %v5245_v15 = vsel %vm3563_vm0, 4294967295, %v5244_v15  ;;  %vm5246_vm13 = vcmp.eq.s32.totalorder %v2869_v7, %v3031_v33  ;;  %vm5247_vm3 = vcmp.eq.s32.totalorder %v2872_v8, %v3031_v33  ;;  %vm119_vm1 = vcmp.eq.s32.totalorder %v3150_v43, %v3339_v56 }
  0x53   :  { %1991 = vmatprep.subr.msk.bf16.mxu1 %vm2966_vm2, %v5042_v17  ;;  %501 = vmatprep.mubr.bf16.mxu0 %v5027_v1  ;;  %v5242_v12 = vsel %vm3546_vm12, 4294967295, %v5241_v12  ;;  %vm3579_vm2 = vmpackc.low %vm5247_vm3, %vm5246_vm13  ;;  %vm5253_vm13 = vcmp.eq.s32.totalorder %v2869_v7, %v3034_v34  ;;  %vm5254_vm3 = vcmp.eq.s32.totalorder %v2872_v8, %v3034_v34  ;;  %vm5259_vm9 = vcmp.eq.s32.totalorder %v2892_v14, %v3031_v33 }
  0x54   :  { %554 = vmatprep.mubr.bf16.mxu1 %v5027_v1  ;;  %v5249_v23 = vsel %vm3579_vm2, 4294967295, %v5248_v23  ;;  %vm3600_vm2 = vmpackc.low %vm5254_vm3, %vm5253_vm13  ;;  %v5260_v1 = vmov 0  ;;  %vm5263_vm13 = vcmp.eq.s32.totalorder %v2880_v10, %v3034_v34  ;;  %vm5264_vm3 = vcmp.eq.s32.totalorder %v2892_v14, %v3034_v34 }
  0x55   :  { %2542 = vmatpush3.bf16.msk.msra.mxu0 %vm3505_vm15, %v5042_v17  ;;  %5250 = vst [vmem:[#allocation11_spill] sm:$0xff] %v5249_v23  ;;  %v5256_v0 = vsel %vm3600_vm2, 4294967295, %v5255_v0  ;;  %vm3629_vm2 = vmpackc.low %vm5264_vm3, %vm5263_vm13  ;;  %vm109_vm3 = vcmp.eq.s32.totalorder %v2862_v2, %v3339_v56  ;;  %vm5283_vm13 = vcmp.eq.s32.totalorder %v2989_v27, %v3031_v33  ;;  %v5287_v23 = vmov 1.0|1.0  }
  0x56   :  { %1993 = vmatpush1.bf16.msk.msra.mxu1 %vm2994_vm10, %v5042_v17  ;;  %2543 = vmatprep.subr.msk.bf16.mxu0 %vm3541_vm6, %v5042_v17  ;;  %vm3590_vm10 = vmpackc.low %vm134_vm7, %vm129_vm4  ;;  %5257 = vst [vmem:[#allocation12_spill] sm:$0xff] %v5256_v0  ;;  %vm124_vm4 = vcmp.eq.s32.totalorder %v3170_v45, %v3339_v56  ;;  %vm5258_vm7 = vcmp.eq.s32.totalorder %v2880_v10, %v3031_v33  ;;  %v5265_v0 = vmov 0 }
  0x57   :  { %1995 = vmatprep.subr.msk.bf16.mxu1 %vm3016_vm11, %v5042_v17  ;;  %v5252_v50 = vsel %vm3590_vm10, 4294967295, %v5251_v50  ;;  %vm3615_vm11 = vmpackc.low %vm5259_vm9, %vm5258_vm7  ;;  %v5266_v0 = vsel %vm3629_vm2, 4294967295, %v5265_v0  ;;  %vm5268_vm9 = vcmp.eq.s32.totalorder %v2931_v19, %v3031_v33  ;;  %vm5269_vm7 = vcmp.eq.s32.totalorder %v2934_v20, %v3031_v33 }
  0x58   :  { %502 = vmatmul.mubr.bf16.gmra.mxu0 %v3550_v13  ;;  %v5261_v1 = vsel %vm3615_vm11, 4294967295, %v5260_v1  ;;  %5267 = vst [vmem:[#allocation14_spill] sm:$0xff] %v5266_v0  ;;  %vm3645_vm11 = vmpackc.low %vm5269_vm7, %vm5268_vm9  ;;  %vm5273_vm2 = vnez %v5159_v40  ;;  %v5274_v0 = vmov 0  ;;  %vm5276_vm9 = vcmp.eq.s32.totalorder %v2931_v19, %v3034_v34 }
  0x59   :  { %5262 = vst [vmem:[#allocation13_spill] sm:$0xff] %v5261_v1  ;;  %2544 = vmatpush3.bf16.msk.msra.mxu0 %vm3541_vm6, %v5042_v17  ;;  %555 = vmatmul.mubr.bf16.gmra.mxu1 %v3550_v13  ;;  %v5270_v1 = vmov 0  ;;  %vm5277_vm7 = vcmp.eq.s32.totalorder %v2934_v20, %v3034_v34 }
  0x5a   :  { %1997 = vmatpush1.bf16.msk.msra.mxu1 %vm3056_vm14, %v5042_v17  ;;  %2545 = vmatprep.subr.msk.bf16.mxu0 %vm3546_vm12, %v5042_v17  ;;  %v5271_v1 = vsel %vm3645_vm11, 4294967295, %v5270_v1  ;;  %vm3656_vm14 = vmpackc.low %vm124_vm4, %vm119_vm1  ;;  %vm114_vm1 = vcmp.eq.s32.totalorder %v3173_v46, %v3339_v56  ;;  %vm5282_vm4 = vcmp.eq.s32.totalorder %v2986_v26, %v3031_v33  ;;  %v5290_v56 = vmov 0 }
  0x5b   :  { %5272 = vst [vmem:[#allocation15_spill] sm:$0xff] %v5271_v1  ;;  %1999 = vmatprep.subr.msk.bf16.mxu1 %vm5273_vm2, %v5042_v17  ;;  %v5275_v0 = vsel %vm3656_vm14, 4294967295, %v5274_v0  ;;  %2555 = vmatprep.mubr.bf16.mxu0 %v2726_v4  ;;  %vm3666_vm11 = vmpackc.low %vm5277_vm7, %vm5276_vm9  ;;  %v5278_v1 = vmov 0  ;;  %v5281_v17 = vmov 0   ;;  %v5284_v4 = vmov 0 }
  0x5c   :  { %v5279_v1 = vsel %vm3666_vm11, 4294967295, %v5278_v1  ;;  %658 = vmatprep.mubr.bf16.mxu1 %v5281_v17  ;;  %vm3681_vm2 = vmpackc.low %vm5283_vm13, %vm5282_vm4  ;;  %vm5288_vm9 = vcmp.eq.s32.totalorder %v2986_v26, %v3034_v34  ;;  %vm5289_vm7 = vcmp.eq.s32.totalorder %v2989_v27, %v3034_v34  ;;  %vm5293_vm13 = vnez %v5167_v42 }
  0x5d   :  { %5280 = vst [vmem:[#allocation16_spill] sm:$0xff] %v5279_v1  ;;  %v5285_v4 = vsel %vm3681_vm2, 4294967295, %v5284_v4  ;;  %2546 = vmatpush3.bf16.msk.msra.mxu0 %vm3546_vm12, %v5287_v23  ;;  %vm3694_vm11 = vmpackc.low %vm5289_vm7, %vm5288_vm9  ;;  %vm5294_vm4 = vcmp.eq.s32.totalorder %v3025_v31, %v3031_v33  ;;  %vm5295_vm2 = vcmp.eq.s32.totalorder %v3028_v32, %v3031_v33  ;;  %vm5307_vm7 = vcmp.eq.s32.totalorder %v3067_v37, %v3031_v33 }
  0x5e   :  { %5286 = vst [vmem:[#allocation17_spill] sm:$0xff] %v5285_v4  ;;  %v5291_v56 = vsel %vm3694_vm11, 4294967295, %v5290_v56  ;;  %2001 = vmatpush1.bf16.msk.msra.mxu1 %vm5293_vm13, %v5287_v23  ;;  %2547 = vmatprep.subr.msk.bf16.mxu0 %vm3563_vm0, %v5287_v23  ;;  %vm3710_vm12 = vmpackc.low %vm5295_vm2, %vm5294_vm4  ;;  %v5296_v4 = vmov 0  ;;  %vm5299_vm11 = vnez %v5175_v47  ;;  %vm5302_vm2 = vcmp.eq.s32.totalorder %v3025_v31, %v3034_v34 }
  0x5f   :  { %5292 = vst [vmem:[#allocation18_spill] sm:$0xff] %v5291_v56  ;;  %v5297_v4 = vsel %vm3710_vm12, 4294967295, %v5296_v4  ;;  %2003 = vmatprep.subr.msk.bf16.mxu1 %vm5299_vm11, %v5287_v23  ;;  %vm3721_vm13 = vmpackc.low %vm114_vm1, %vm109_vm3  ;;  %v5300_v56 = vmov 0  ;;  %vm5303_vm4 = vcmp.eq.s32.totalorder %v3028_v32, %v3034_v34  ;;  %vm5308_vm9 = vcmp.eq.s32.totalorder %v3089_v39, %v3031_v33 }
  0x60   :  { %5298 = vst [vmem:[#allocation19_spill] sm:$0xff] %v5297_v4  ;;  %v5301_v56 = vsel %vm3721_vm13, 4294967295, %v5300_v56  ;;  %vm3731_vm12 = vmpackc.low %vm5303_vm4, %vm5302_vm2  ;;  %v5304_v4 = vmov 0  ;;  %v5309_v1 = vmov 0  ;;  %vm5312_vm1 = vcmp.eq.s32.totalorder %v3067_v37, %v3034_v34 }
  0x61   :  { %v5305_v4 = vsel %vm3731_vm12, 4294967295, %v5304_v4  ;;  %vm3741_vm3 = vmpackc.low %vm5308_vm9, %vm5307_vm7  ;;  %2548 = vmatpush3.bf16.msk.msra.mxu0 %vm3563_vm0, %v5287_v23  ;;  %vm5313_vm2 = vcmp.eq.s32.totalorder %v3089_v39, %v3034_v34  ;;  %vm319_vm9 = vcmp.eq.s32.totalorder %v2862_v2, %v3031_v33  ;;  %vm5317_vm7 = vnez %v5183_v49 }
  0x62   :  { %5306 = vst [vmem:[#allocation20_spill] sm:$0xff] %v5305_v4  ;;  %v5310_v1 = vsel %vm3741_vm3, 4294967295, %v5309_v1  ;;  %vm3754_vm4 = vmpackc.low %vm5313_vm2, %vm5312_vm1  ;;  %v5314_v4 = vmov 0  ;;  %2005 = vmatpush1.bf16.msk.msra.mxu1 %vm5317_vm7, %v5287_v23  ;;  %2549 = vmatprep.subr.msk.bf16.mxu0 %vm3590_vm10, %v5287_v23  ;;  %vm5318_vm3 = vcmp.eq.s32.totalorder %v3150_v43, %v3031_v33  ;;  %vm5319_vm1 = vcmp.eq.s32.totalorder %v3170_v45, %v3031_v33 }
  0x63   :  { %5311 = vst [vmem:[#allocation21_spill] sm:$0xff] %v5310_v1  ;;  %v5315_v4 = vsel %vm3754_vm4, 4294967295, %v5314_v4  ;;  %vm3772_vm2 = vmpackc.low %vm5319_vm1, %vm5318_vm3  ;;  %v5320_v1 = vmov 0  ;;  %vm318_vm4 = vcmp.eq.s32.totalorder %v2862_v2, %v3034_v34  ;;  %vm5323_vm11 = vnez %v5191_v52 }
  0x64   :  { %5316 = vst [vmem:[#allocation22_spill] sm:$0xff] %v5315_v4  ;;  %v5321_v1 = vsel %vm3772_vm2, 4294967295, %v5320_v1  ;;  %2007 = vmatprep.subr.msk.bf16.mxu1 %vm5323_vm11, %v5287_v23  ;;  %vm5324_vm0 = vcmp.eq.s32.totalorder %v3150_v43, %v3034_v34  ;;  %vm5325_vm3 = vcmp.eq.s32.totalorder %v3170_v45, %v3034_v34  ;;  %vm5328_vm12 = vcmp.eq.s32.totalorder %v3173_v46, %v3031_v33 }
  0x65   :  { %5322 = vst [vmem:[#allocation23_spill] sm:$0xff] %v5321_v1  ;;  %vm3791_vm1 = vmpackc.low %vm5325_vm3, %vm5324_vm0  ;;  %v5326_v1 = vmov 0  ;;  %v5329_v4 = vmov 0  ;;  %2550 = vmatpush3.bf16.msk.msra.mxu0 %vm3590_vm10, %v5287_v23  ;;  %vm5331_vm7 = vcmp.eq.s32.totalorder %v3173_v46, %v3034_v34  ;;  %v5332_v52 = vmov 0 }
  0x66   :  { %v5327_v1 = vsel %vm3791_vm1, 4294967295, %v5326_v1  ;;  %vm3798_vm2 = vmpackc.low %vm5328_vm12, %vm319_vm9  ;;  %vm5334_vm0 = vnez %v5200_v54  ;;  %2551 = vmatprep.subr.msk.bf16.mxu0 %vm3656_vm14, %v5287_v23  ;;  %vm5335_vm12 = vcmp.eq.s32.totalorder %v2869_v7, %v3447_v62  ;;  %vm5336_vm9 = vcmp.eq.s32.totalorder %v2872_v8, %v3447_v62 }
  0x67   :  { %v5330_v4 = vsel %vm3798_vm2, 4294967295, %v5329_v4  ;;  %vm3808_vm11 = vmpackc.low %vm5331_vm7, %vm318_vm4  ;;  %2009 = vmatpush1.bf16.msk.msra.mxu1 %vm5334_vm0, %v5287_v23  ;;  %v5337_v33 = vmov 0  ;;  %vm326_vm4 = vcmp.eq.s32.totalorder %v3150_v43, %v3447_v62  ;;  %vm329_vm7 = vcmp.eq.s32.totalorder %v3170_v45, %v3447_v62  ;;  %v5426_v34 = vld [vmem:[#allocation19_spill] sm:$0xff] }
  0x68   :  { %v5333_v52 = vsel %vm3808_vm11, 4294967295, %v5332_v52  ;;  %vm3824_vm3 = vmpackc.low %vm5336_vm9, %vm5335_vm12  ;;  %vm5339_vm11 = vnez %v5208_v57  ;;  %vm5340_vm2 = vcmp.eq.s32.totalorder %v2880_v10, %v3447_v62  ;;  %vm5341_vm1 = vcmp.eq.s32.totalorder %v2892_v14, %v3447_v62 }
  0x69   :  { %v5338_v33 = vsel %vm3824_vm3, 4294967295, %v5337_v33  ;;  %2011 = vmatprep.subr.msk.bf16.mxu1 %vm5339_vm11, %v5287_v23  ;;  %vm3841_vm12 = vmpackc.low %vm5341_vm1, %vm5340_vm2  ;;  %v5342_v7 = vmov 0  ;;  %vm5344_vm9 = vcmp.eq.s32.totalorder %v2931_v19, %v3447_v62  ;;  %vm5345_vm3 = vcmp.eq.s32.totalorder %v2934_v20, %v3447_v62  ;;  %2552 = vmatpush3.bf16.msk.msra.mxu0 %vm3656_vm14, %v5287_v23 }
  0x6a   :  { %v5343_v7 = vsel %vm3841_vm12, 4294967295, %v5342_v7  ;;  %vm3851_vm0 = vmpackc.low %vm5345_vm3, %vm5344_vm9  ;;  %v5346_v8 = vmov 0  ;;  %vm5348_vm2 = vcmp.eq.s32.totalorder %v2986_v26, %v3447_v62  ;;  %vm5349_vm1 = vcmp.eq.s32.totalorder %v2989_v27, %v3447_v62  ;;  %2553 = vmatprep.subr.msk.bf16.mxu0 %vm3721_vm13, %v5287_v23  ;;  %v2729_v27 = vld [vmem:[#allocation3 + $0x8] sm:$0xff]  }
  0x6b   :  { %v5347_v8 = vsel %vm3851_vm0, 4294967295, %v5346_v8  ;;  %vm3864_vm12 = vmpackc.low %vm5349_vm1, %vm5348_vm2  ;;  %v5350_v10 = vmov 0  ;;  %vm5352_vm3 = vnez %v5216_v59  ;;  %vm5353_vm9 = vcmp.eq.s32.totalorder %v3025_v31, %v3447_v62  ;;  %v5421_v31 = vld [vmem:[#allocation17_spill] sm:$0xff] }
  0x6c   :  { %v5351_v10 = vsel %vm3864_vm12, 4294967295, %v5350_v10  ;;  %2013 = vmatpush1.bf16.msk.msra.mxu1 %vm5352_vm3, %v5287_v23  ;;  %vm5354_vm0 = vcmp.eq.s32.totalorder %v3028_v32, %v3447_v62  ;;  %v5355_v14 = vmov 0  ;;  %vm320_vm2 = vcmp.eq.s32.totalorder %v2862_v2, %v3447_v62  ;;  %v2728_v2 = vld [vmem:[#allocation3] sm:$0xff]   ;;  %v5423_v32 = vld [vmem:[#allocation18_spill] sm:$0xff] }
  0x6d   :  { %vm3880_vm11 = vmpackc.low %vm5354_vm0, %vm5353_vm9  ;;  %vm323_vm1 = vcmp.eq.s32.totalorder %v3173_v46, %v3447_v62  ;;  %vm5357_vm12 = vnez %v5224_v61  ;;  %vm5358_vm3 = vcmp.eq.s32.totalorder %v3067_v37, %v3447_v62  ;;  %vm5359_vm14 = vcmp.eq.s32.totalorder %v3089_v39, %v3447_v62  ;;  %2554 = vmatpush3.bf16.msk.msra.mxu0 %vm3721_vm13, %v5287_v23  ;;  %v5433_v37 = vld [vmem:[#allocation22_spill] sm:$0xff]  ;;  %v2732_v39 = vld [vmem:[#allocation5 + $0x10] sm:$0xff]  }
  0x6e   :  { %v5356_v14 = vsel %vm3880_vm11, 4294967295, %v5355_v14  ;;  %2015 = vmatprep.subr.msk.bf16.mxu1 %vm5357_vm12, %v5287_v23  ;;  %vm3897_vm0 = vmpackc.low %vm5359_vm14, %vm5358_vm3  ;;  %v5360_v19 = vmov 0  ;;  %v5362_v20 = vmov 0  ;;  %v5364_v26 = vmov 0 }
  0x6f   :  { %v5361_v19 = vsel %vm3897_vm0, 4294967295, %v5360_v19  ;;  %vm3901_vm9 = vmpackc.low %vm329_vm7, %vm326_vm4  ;;  %vm5366_vm14 = vnez %v5133_v18  ;;  %vm5367_vm4 = vnez %v5137_v22  ;;  %vm5368_vm7 = vnez %v5141_v25  ;;  %v2730_v18 = vld [vmem:[#allocation3 + $0x20] sm:$0xff]   ;;  %v2731_v25 = vld [vmem:[#allocation3 + $0x28] sm:$0xff]  }
  0x70   :  { %v5363_v20 = vsel %vm3901_vm9, 4294967295, %v5362_v20  ;;  %vm3908_vm11 = vmpackc.low %vm323_vm1, %vm320_vm2  ;;  %2017 = vmatpush1.bf16.msk.msra.mxu1 %vm3472_vm5, %v5287_v23  ;;  %2019 = vmatprep.subr.msk.bf16.mxu0 %vm5366_vm14, %v5287_v23  ;;  %vm5369_vm3 = vnez %v5145_v29  ;;  %vm5370_vm2 = vnez %v5150_v35  ;;  %vm5371_vm1 = vnez %v5156_v38  ;;  %v5408_v22 = vld [vmem:[#allocation12_spill] sm:$0xff]  ;;  %v5416_v29 = vld [vmem:[#allocation15_spill] sm:$0xff] }
  0x71   :  { %v5365_v26 = vsel %vm3908_vm11, 4294967295, %v5364_v26  ;;  %2559 = vmatprep.subr.msk.bf16.mxu1 %vm3495_vm8, %v5287_v23  ;;  %2556 = vmatmul.mubr.bf16.vlgmr.msra.gmra.mxu0 %v3550_v13  ;;  %vm5372_vm11 = vnez %v5163_v41  ;;  %vm5373_vm9 = vnez %v5242_v12  ;;  %vm5374_vm0 = vnez %v5171_v44  ;;  %v5428_v35 = vld [vmem:[#allocation20_spill] sm:$0xff]  ;;  %v5436_v38 = vld [vmem:[#allocation23_spill] sm:$0xff] }
  0x72   :  { %2021 = vmatpush1.bf16.msk.msra.mxu0 %vm5367_vm4, %v5287_v23  ;;  %711 = vmatprep.mubr.bf16.mxu0 %v5281_v17  ;;  %vm5378_vm5 = vnez %v5196_v53  ;;  %vm5380_vm12 = vnez %v5212_v58  ;;  %v2735_v41 = vld [vmem:[#allocation5 + $0x8] sm:$0xff]   ;;  %v2738_v58 = vld [vmem:[#allocation7 + $0x10] sm:$0xff]  }
  0x73   :  { %659 = vmatmul.mubr.bf16.vlgmr.msra.gmra.mxu1 %v2728_v2  ;;  %2023 = vmatprep.subr.msk.bf16.mxu0 %vm5368_vm7, %v5287_v23  ;;  %v2737_v44 = vld [vmem:[#allocation5 + $0x28] sm:$0xff]  }
  0x74   :  { %2560 = vmatpush3.bf16.msk.msra.mxu1 %vm3495_vm8, %v5287_v23  ;;  %668 = vmatprep.mubr.bf16.mxu1 %v5281_v17  ;;  %vm5377_vm8 = vnez %v5187_v51 }
  0x75   :  { %2561 = vmatprep.subr.msk.bf16.mxu1 %vm3505_vm15, %v5287_v23 }
  0x76   :  { %2025 = vmatpush1.bf16.msk.msra.mxu0 %vm5369_vm3, %v5287_v23 }
  0x77   :  { %2027 = vmatprep.subr.msk.bf16.mxu0 %vm5370_vm2, %v5287_v23 }
  0x78   :  { %2562 = vmatpush3.bf16.msk.msra.mxu1 %vm3505_vm15, %v5287_v23  ;;  %vm5376_vm15 = vnez %v5245_v15 }
  0x79   :  { %2563 = vmatprep.subr.msk.bf16.mxu1 %vm3541_vm6, %v5287_v23 }
  0x7a   :  { %2029 = vmatpush1.bf16.msk.msra.mxu0 %vm5371_vm1, %v5287_v23 }
  0x7b   :  { %669 = vmatmul.mubr.bf16.gmra.mxu1 %v2729_v27  ;;  %2031 = vmatprep.subr.msk.bf16.mxu0 %vm5372_vm11, %v5287_v23 }
  0x7c   :  { %2564 = vmatpush3.bf16.msk.msra.mxu1 %vm3541_vm6, %v5287_v23  ;;  %2575 = vmatprep.mubr.bf16.mxu1 %v2728_v2  ;;  %vm5375_vm6 = vnez %v5179_v48 }
  0x7d   :  { %2565 = vmatprep.subr.msk.bf16.mxu1 %vm5373_vm9, %v5287_v23 }
  0x7e   :  { %2033 = vmatpush1.bf16.msk.msra.mxu0 %vm5374_vm0, %v5287_v23 }
  0x7f   :  { %2035 = vmatprep.subr.msk.bf16.mxu0 %vm5375_vm6, %v5287_v23 }
  0x80   :  { %2566 = vmatpush3.bf16.msk.msra.mxu1 %vm5373_vm9, %v5287_v23  ;;  %vm5379_vm9 = vnez %v5204_v55 }
  0x81   :  { %2567 = vmatprep.subr.msk.bf16.mxu1 %vm5376_vm15, %v5287_v23 }
  0x82   :  { %2037 = vmatpush1.bf16.msk.msra.mxu0 %vm5377_vm8, %v5287_v23 }
  0x83   :  { %2039 = vmatprep.subr.msk.bf16.mxu0 %vm5378_vm5, %v5287_v23  ;;  %vm5382_vm5 = vnez %v5220_v60 }
  0x84   :  { %2568 = vmatpush3.bf16.msk.msra.mxu1 %vm5376_vm15, %v5287_v23  ;;  %vm5381_vm15 = vnez %v5275_v0 }
  0x85   :  { %2569 = vmatprep.subr.msk.bf16.mxu1 %vm3590_vm10, %v5287_v23 }
  0x86   :  { %2041 = vmatpush1.bf16.msk.msra.mxu0 %vm5379_vm9, %v5287_v23  ;;  %vm5383_vm9 = vnez %v5228_v63 }
  0x87   :  { %2043 = vmatprep.subr.msk.bf16.mxu0 %vm5380_vm12, %v5287_v23 }
  0x88   :  { %2570 = vmatpush3.bf16.msk.msra.mxu1 %vm3590_vm10, %v5287_v23  ;;  %vm5384_vm10 = vnez %v5234_v5 }
  0x89   :  { %2571 = vmatprep.subr.msk.bf16.mxu1 %vm5381_vm15, %v5287_v23 }
  0x8a   :  { %2045 = vmatpush1.bf16.msk.msra.mxu0 %vm5382_vm5, %v5287_v23  ;;  %vm5385_vm5 = vnez %v5131_v16  ;;  %v5395_v16 = vld [vmem:[#allocation10_spill] sm:$0xff] }
  0x8b   :  { %2047 = vmatprep.subr.msk.bf16.mxu0 %vm5383_vm9, %v5287_v23 }
  0x8c   :  { %2572 = vmatpush3.bf16.msk.msra.mxu1 %vm5381_vm15, %v5287_v23  ;;  %vm5386_vm15 = vnez %v5135_v21  ;;  %v5406_v21 = vld [vmem:[#allocation11_spill] sm:$0xff] }
  0x8d   :  { %2573 = vmatprep.subr.msk.bf16.mxu1 %vm3721_vm13, %v5287_v23 }
  0x8e   :  { %2049 = vmatpush1.bf16.msk.msra.mxu0 %vm5384_vm10, %v5287_v23 }
  0x8f   :  { %2069 = vmatprep.subr.msk.bf16.mxu0 %vm5385_vm5, %v5287_v23  ;;  %vm5388_vm5 = vnez %v5143_v28  ;;  %v5413_v28 = vld [vmem:[#allocation14_spill] sm:$0xff] }
  0x90   :  { %2574 = vmatpush3.bf16.msk.msra.mxu1 %vm3721_vm13, %v5287_v23  ;;  %vm5387_vm13 = vnez %v5139_v24  ;;  %v5411_v24 = vld [vmem:[#allocation13_spill] sm:$0xff] }
  0x91   :  { %2101 = vmatprep.subr.msk.bf16.mxu1 %vm5366_vm14, %v5287_v23  ;;  %712 = vmatmul.mubr.bf16.vlgmr.msra.gmra.mxu0 %v2728_v2  ;;  %vm5391_vm14 = vnez %v5159_v40  ;;  %v2734_v40 = vld [vmem:[#allocation5] sm:$0xff]  }
  0x92   :  { %2071 = vmatpush1.bf16.msk.msra.mxu0 %vm5386_vm15, %v5287_v23  ;;  %721 = vmatprep.mubr.bf16.mxu0 %v5281_v17  ;;  %vm5389_vm15 = vnez %v5147_v30  ;;  %v5418_v30 = vld [vmem:[#allocation16_spill] sm:$0xff] }
  0x93   :  { %2576 = vmatmul.mubr.bf16.vlgmr.msra.gmra.mxu1 %v2729_v27  ;;  %2073 = vmatprep.subr.msk.bf16.mxu0 %vm5387_vm13, %v5287_v23  ;;  %vm5390_vm13 = vnez %v5152_v36  ;;  %v5431_v36 = vld [vmem:[#allocation21_spill] sm:$0xff] }
  0x94   :  { %2103 = vmatpush1.bf16.msk.msra.mxu1 %vm5367_vm4, %v5287_v23  ;;  %883 = vmatprep.mubr.bf16.mxu1 %v5281_v17  ;;  %vm5392_vm4 = vnez %v5167_v42  ;;  %v2736_v42 = vld [vmem:[#allocation5 + $0x20] sm:$0xff]  }
  0x95   :  { %2105 = vmatprep.subr.msk.bf16.mxu1 %vm5368_vm7, %v5287_v23  ;;  %vm5393_vm7 = vnez %v5175_v47 }
  0x96   :  { %2075 = vmatpush1.bf16.msk.msra.mxu0 %vm5388_vm5, %v5287_v23  ;;  %vm5402_vm5 = vnez %v5220_v60 }
  0x97   :  { %2077 = vmatprep.subr.msk.bf16.mxu0 %vm5389_vm15, %v5287_v23  ;;  %vm5403_vm15 = vnez %v5224_v61 }
  0x98   :  { %2107 = vmatpush1.bf16.msk.msra.mxu1 %vm5369_vm3, %v5287_v23  ;;  %vm5394_vm3 = vnez %v5183_v49 }
  0x99   :  { %2109 = vmatprep.subr.msk.bf16.mxu1 %vm5370_vm2, %v5287_v23  ;;  %722 = vmatmul.mubr.bf16.gmra.mxu0 %v2729_v27  ;;  %vm5398_vm2 = vnez %v5200_v54 }
  0x9a   :  { %2079 = vmatpush1.bf16.msk.msra.mxu0 %vm5390_vm13, %v5287_v23  ;;  %830 = vmatprep.mubr.bf16.mxu0 %v5281_v17  ;;  %vm5405_vm13 = vnez %v5236_v6  ;;  %v2739_v6 = vld [vmem:[#allocation7 + $0x18] sm:$0xff]  }
  0x9b   :  { %2081 = vmatprep.subr.msk.bf16.mxu0 %vm5391_vm14, %v5287_v23  ;;  %vm5407_vm14 = vnez %v5406_v21 }
  0x9c   :  { %2111 = vmatpush1.bf16.msk.msra.mxu1 %vm5371_vm1, %v5287_v23  ;;  %vm5400_vm1 = vnez %v5208_v57 }
  0x9d   :  { %2113 = vmatprep.subr.msk.bf16.mxu1 %vm5372_vm11, %v5287_v23  ;;  %vm5396_vm11 = vnez %v5395_v16 }
  0x9e   :  { %2083 = vmatpush1.bf16.msk.msra.mxu0 %vm5392_vm4, %v5287_v23  ;;  %vm5412_vm4 = vnez %v5411_v24 }
  0x9f   :  { %2085 = vmatprep.subr.msk.bf16.mxu0 %vm5393_vm7, %v5287_v23  ;;  %vm5414_vm7 = vnez %v5413_v28 }
  0xa0   :  { %2115 = vmatpush1.bf16.msk.msra.mxu1 %vm5374_vm0, %v5287_v23  ;;  %vm5397_vm0 = vnez %v5196_v53 }
  0xa1   :  { %2117 = vmatprep.subr.msk.bf16.mxu1 %vm5375_vm6, %v5287_v23  ;;  %vm5399_vm6 = vnez %v5204_v55 }
  0xa2   :  { %2087 = vmatpush1.bf16.msk.msra.mxu0 %vm5394_vm3, %v5287_v23  ;;  %vm5415_vm3 = vnez %v5240_v11 }
  0xa3   :  { %2089 = vmatprep.subr.msk.bf16.mxu0 %vm5396_vm11, %v5287_v23  ;;  %vm5417_vm11 = vnez %v5416_v29 }
  0xa4   :  { %2119 = vmatpush1.bf16.msk.msra.mxu1 %vm5377_vm8, %v5287_v23  ;;  %vm5401_vm8 = vnez %v5216_v59 }
  0xa5   :  { %2121 = vmatprep.subr.msk.bf16.mxu1 %vm5397_vm0, %v5287_v23  ;;  %vm5419_vm0 = vnez %v5418_v30 }
  0xa6   :  { %2091 = vmatpush1.bf16.msk.msra.mxu0 %vm5398_vm2, %v5287_v23  ;;  %vm5420_vm2 = vnez %v5242_v12 }
  0xa7   :  { %2093 = vmatprep.subr.msk.bf16.mxu0 %vm5400_vm1, %v5287_v23  ;;  %vm5424_vm1 = vnez %v5423_v32 }
  0xa8   :  { %2123 = vmatpush1.bf16.msk.msra.mxu1 %vm5399_vm6, %v5287_v23  ;;  %vm5422_vm6 = vnez %v5421_v31 }
  0xa9   :  { %2125 = vmatprep.subr.msk.bf16.mxu1 %vm5380_vm12, %v5287_v23  ;;  %vm5404_vm12 = vnez %v5231_v3 }
  0xaa   :  { %2095 = vmatpush1.bf16.msk.msra.mxu0 %vm5401_vm8, %v5287_v23  ;;  %vm5425_vm8 = vnez %v5245_v15 }
  0xab   :  { %2097 = vmatprep.subr.msk.bf16.mxu0 %vm5403_vm15, %v5287_v23  ;;  %vm5429_vm15 = vnez %v5428_v35 }
  0xac   :  { %2127 = vmatpush1.bf16.msk.msra.mxu1 %vm5402_vm5, %v5287_v23  ;;  %vm5427_vm5 = vnez %v5426_v34 }
  0xad   :  { %2129 = vmatprep.subr.msk.bf16.mxu1 %vm5383_vm9, %v5287_v23  ;;  %vm5409_vm9 = vnez %v5408_v22 }
  0xae   :  { %2099 = vmatpush1.bf16.msk.msra.mxu0 %vm5404_vm12, %v5287_v23  ;;  %vm5430_vm12 = vnez %v5252_v50 }
  0xaf   :  { %2579 = vmatprep.subr.msk.bf16.mxu0 %vm5405_vm13, %v5287_v23 }
  0xb0   :  { %2131 = vmatpush1.bf16.msk.msra.mxu1 %vm5384_vm10, %v5287_v23  ;;  %vm5410_vm10 = vnez %v5238_v9 }
  0xb1   :  { %2151 = vmatprep.subr.msk.bf16.mxu1 %vm5407_vm14, %v5287_v23  ;;  %831 = vmatmul.mubr.bf16.vlgmr.msra.gmra.mxu0 %v2730_v18 }
  0xb2   :  { %2580 = vmatpush3.bf16.msk.msra.mxu0 %vm5405_vm13, %v5287_v23  ;;  %840 = vmatprep.mubr.bf16.mxu0 %v5281_v17  ;;  %vm5432_vm13 = vnez %v5431_v36 }
  0xb3   :  { %884 = vmatmul.mubr.bf16.vlgmr.msra.gmra.mxu1 %v2730_v18  ;;  %2581 = vmatprep.subr.msk.bf16.mxu0 %vm5410_vm10, %v5287_v23 }
  0xb4   :  { %2153 = vmatpush1.bf16.msk.msra.mxu1 %vm5409_vm9, %v5287_v23  ;;  %893 = vmatprep.mubr.bf16.mxu1 %v5281_v17 }
  0xb5   :  { %2155 = vmatprep.subr.msk.bf16.mxu1 %vm5412_vm4, %v5287_v23 }
  0xb6   :  { %2582 = vmatpush3.bf16.msk.msra.mxu0 %vm5410_vm10, %v5287_v23  ;;  %vm5434_vm10 = vnez %v5433_v37 }
  0xb7   :  { %2583 = vmatprep.subr.msk.bf16.mxu0 %vm5415_vm3, %v5287_v23 }
  0xb8   :  { %2157 = vmatpush1.bf16.msk.msra.mxu1 %vm5414_vm7, %v5287_v23 }
  0xb9   :  { %2159 = vmatprep.subr.msk.bf16.mxu1 %vm5417_vm11, %v5287_v23  ;;  %841 = vmatmul.mubr.bf16.gmra.mxu0 %v2731_v25 }
  0xba   :  { %2584 = vmatpush3.bf16.msk.msra.mxu0 %vm5415_vm3, %v5287_v23  ;;  %2595 = vmatprep.mubr.bf16.mxu0 %v2730_v18  ;;  %vm5435_vm3 = vnez %v5275_v0  ;;  %v2733_v0 = vld [vmem:[#allocation5 + $0x18] sm:$0xff]  }
  0xbb   :  { %894 = vmatmul.mubr.bf16.gmra.mxu1 %v2731_v25  ;;  %2585 = vmatprep.subr.msk.bf16.mxu0 %vm5420_vm2, %v5287_v23 }
  0xbc   :  { %2161 = vmatpush1.bf16.msk.msra.mxu1 %vm5419_vm0, %v5287_v23  ;;  %1026 = vmatprep.mubr.bf16.mxu1 %v5281_v17 }
  0xbd   :  { %2163 = vmatprep.subr.msk.bf16.mxu1 %vm5422_vm6, %v5287_v23 }
  0xbe   :  { %2586 = vmatpush3.bf16.msk.msra.mxu0 %vm5420_vm2, %v5287_v23  ;;  %vm5437_vm2 = vnez %v5436_v38 }
  0xbf   :  { %2587 = vmatprep.subr.msk.bf16.mxu0 %vm5425_vm8, %v5287_v23 }
  0xc0   :  { %2165 = vmatpush1.bf16.msk.msra.mxu1 %vm5424_vm1, %v5287_v23 }
  0xc1   :  { %2167 = vmatprep.subr.msk.bf16.mxu1 %vm5427_vm5, %v5287_v23 }
  0xc2   :  { %2588 = vmatpush3.bf16.msk.msra.mxu0 %vm5425_vm8, %v5287_v23  ;;  %vm5438_vm8 = vnez %v5327_v1 }
  0xc3   :  { %2589 = vmatprep.subr.msk.bf16.mxu0 %vm5430_vm12, %v5287_v23 }
  0xc4   :  { %2169 = vmatpush1.bf16.msk.msra.mxu1 %vm5429_vm15, %v5287_v23 }
  0xc5   :  { %2171 = vmatprep.subr.msk.bf16.mxu1 %vm5432_vm13, %v5287_v23 }
  0xc6   :  { %2590 = vmatpush3.bf16.msk.msra.mxu0 %vm5430_vm12, %v5287_v23  ;;  %vm5439_vm12 = vnez %v5301_v56 }
  0xc7   :  { %2591 = vmatprep.subr.msk.bf16.mxu0 %vm5435_vm3, %v5287_v23 }
  0xc8   :  { %2173 = vmatpush1.bf16.msk.msra.mxu1 %vm5434_vm10, %v5287_v23  ;;  %vm5440_vm10 = vnez %v5330_v4 }
  0xc9   :  { %2175 = vmatprep.subr.msk.bf16.mxu1 %vm5437_vm2, %v5287_v23 }
  0xca   :  { %2592 = vmatpush3.bf16.msk.msra.mxu0 %vm5435_vm3, %v5287_v23  ;;  %vm5441_vm3 = vnez %v5333_v52 }
  0xcb   :  { %2593 = vmatprep.subr.msk.bf16.mxu0 %vm5439_vm12, %v5287_v23 }
  0xcc   :  { %2177 = vmatpush1.bf16.msk.msra.mxu1 %vm5438_vm8, %v5287_v23  ;;  %vm5442_vm8 = vnez %v5338_v33 }
  0xcd   :  { %2179 = vmatprep.subr.msk.bf16.mxu1 %vm5440_vm10, %v5287_v23 }
  0xce   :  { %2594 = vmatpush3.bf16.msk.msra.mxu0 %vm5439_vm12, %v5287_v23  ;;  %vm5443_vm12 = vnez %v5343_v7 }
  0xcf   :  { %2599 = vmatprep.subr.msk.bf16.mxu0 %vm5442_vm8, %v5287_v23 }
  0xd0   :  { %2181 = vmatpush1.bf16.msk.msra.mxu1 %vm5441_vm3, %v5287_v23 }
  0xd1   :  { %2201 = vmatprep.subr.msk.bf16.mxu1 %vm5407_vm14, %v5287_v23  ;;  %2596 = vmatmul.mubr.bf16.vlgmr.msra.gmra.mxu0 %v2731_v25 }
  0xd2   :  { %2600 = vmatpush3.bf16.msk.msra.mxu0 %vm5442_vm8, %v5287_v23  ;;  %2615 = vmatprep.mubr.bf16.mxu0 %v2732_v39 }
  0xd3   :  { %1027 = vmatmul.mubr.bf16.vlgmr.msra.gmra.mxu1 %v2732_v39  ;;  %2601 = vmatprep.subr.msk.bf16.mxu0 %vm5443_vm12, %v5287_v23 }
  0xd4   :  { %2203 = vmatpush1.bf16.msk.msra.mxu1 %vm5409_vm9, %v5287_v23  ;;  %1036 = vmatprep.mubr.bf16.mxu1 %v5281_v17  ;;  %vm5444_vm9 = vnez %v5347_v8 }
  0xd5   :  { %2205 = vmatprep.subr.msk.bf16.mxu1 %vm5412_vm4, %v5287_v23 }
  0xd6   :  { %2602 = vmatpush3.bf16.msk.msra.mxu0 %vm5443_vm12, %v5287_v23 }
  0xd7   :  { %2603 = vmatprep.subr.msk.bf16.mxu0 %vm5444_vm9, %v5287_v23 }
  0xd8   :  { %2207 = vmatpush1.bf16.msk.msra.mxu1 %vm5414_vm7, %v5287_v23  ;;  %vm5445_vm7 = vnez %v5351_v10 }
  0xd9   :  { %2209 = vmatprep.subr.msk.bf16.mxu1 %vm5417_vm11, %v5287_v23 }
  0xda   :  { %2604 = vmatpush3.bf16.msk.msra.mxu0 %vm5444_vm9, %v5287_v23 }
  0xdb   :  { %1037 = vmatmul.mubr.bf16.gmra.mxu1 %v2733_v0  ;;  %2605 = vmatprep.subr.msk.bf16.mxu0 %vm5445_vm7, %v5287_v23 }
  0xdc   :  { %2211 = vmatpush1.bf16.msk.msra.mxu1 %vm5419_vm0, %v5287_v23  ;;  %1140 = vmatprep.mubr.bf16.mxu1 %v5281_v17  ;;  %vm5446_vm0 = vnez %v5356_v14 }
  0xdd   :  { %2213 = vmatprep.subr.msk.bf16.mxu1 %vm5422_vm6, %v5287_v23  ;;  %vm5447_vm6 = vnez %v5361_v19 }
  0xde   :  { %2606 = vmatpush3.bf16.msk.msra.mxu0 %vm5445_vm7, %v5287_v23 }
  0xdf   :  { %2607 = vmatprep.subr.msk.bf16.mxu0 %vm5446_vm0, %v5287_v23 }
  0xe0   :  { %2215 = vmatpush1.bf16.msk.msra.mxu1 %vm5424_vm1, %v5287_v23 }
  0xe1   :  { %2217 = vmatprep.subr.msk.bf16.mxu1 %vm5427_vm5, %v5287_v23  ;;  %vm5448_vm5 = vnez %v5433_v37 }
  0xe2   :  { %2608 = vmatpush3.bf16.msk.msra.mxu0 %vm5446_vm0, %v5287_v23  ;;  %vm5449_vm0 = vnez %v5363_v20 }
  0xe3   :  { %2609 = vmatprep.subr.msk.bf16.mxu0 %vm5447_vm6, %v5287_v23 }
  0xe4   :  { %2219 = vmatpush1.bf16.msk.msra.mxu1 %vm5429_vm15, %v5287_v23 }
  0xe5   :  { %2221 = vmatprep.subr.msk.bf16.mxu1 %vm5432_vm13, %v5287_v23  ;;  %vm5450_vm13 = vnez %v5327_v1 }
  0xe6   :  { %2610 = vmatpush3.bf16.msk.msra.mxu0 %vm5447_vm6, %v5287_v23  ;;  %vm5451_vm6 = vnez %v5365_v26 }
  0xe7   :  { %2611 = vmatprep.subr.msk.bf16.mxu0 %vm5449_vm0, %v5287_v23 }
  0xe8   :  { %2223 = vmatpush1.bf16.msk.msra.mxu1 %vm5448_vm5, %v5287_v23 }
  0xe9   :  { %2225 = vmatprep.subr.msk.bf16.mxu1 %vm5437_vm2, %v5287_v23 }
  0xea   :  { %2612 = vmatpush3.bf16.msk.msra.mxu0 %vm5449_vm0, %v5287_v23 }
  0xeb   :  { %2613 = vmatprep.subr.msk.bf16.mxu0 %vm5451_vm6, %v5287_v23 }
  0xec   :  { %2227 = vmatpush1.bf16.msk.msra.mxu1 %vm5450_vm13, %v5287_v23 }
  0xed   :  { %2229 = vmatprep.subr.msk.bf16.mxu1 %vm5440_vm10, %v5287_v23  ;;  %vm5452_vm10 = vnez %v5408_v22 }
  0xee   :  { %2614 = vmatpush3.bf16.msk.msra.mxu0 %vm5451_vm6, %v5287_v23 }
  0xef   :  { %2619 = vmatprep.subr.msk.bf16.mxu0 %vm5442_vm8, %v5287_v23 }
  0xf0   :  { %2231 = vmatpush1.bf16.msk.msra.mxu1 %vm5441_vm3, %v5287_v23 }
  0xf1   :  { %2251 = vmatprep.subr.msk.bf16.mxu1 %vm5407_vm14, %v5287_v23  ;;  %2616 = vmatmul.mubr.bf16.vlgmr.msra.gmra.mxu0 %v2733_v0  ;;  %vm5453_vm14 = vnez %v5413_v28 }
  0xf2   :  { %2620 = vmatpush3.bf16.msk.msra.mxu0 %vm5442_vm8, %v5287_v23  ;;  %2635 = vmatprep.mubr.bf16.mxu0 %v2734_v40 }
  0xf3   :  { %1141 = vmatmul.mubr.bf16.vlgmr.msra.gmra.mxu1 %v2734_v40  ;;  %2621 = vmatprep.subr.msk.bf16.mxu0 %vm5443_vm12, %v5287_v23 }
  0xf4   :  { %2253 = vmatpush1.bf16.msk.msra.mxu1 %vm5452_vm10, %v5287_v23  ;;  %1150 = vmatprep.mubr.bf16.mxu1 %v5281_v17 }
  0xf5   :  { %2255 = vmatprep.subr.msk.bf16.mxu1 %vm5412_vm4, %v5287_v23  ;;  %vm5454_vm4 = vnez %v5418_v30 }
  0xf6   :  { %2622 = vmatpush3.bf16.msk.msra.mxu0 %vm5443_vm12, %v5287_v23 }
  0xf7   :  { %2623 = vmatprep.subr.msk.bf16.mxu0 %vm5444_vm9, %v5287_v23 }
  0xf8   :  { %2257 = vmatpush1.bf16.msk.msra.mxu1 %vm5453_vm14, %v5287_v23  ;;  %vm5455_vm14 = vnez %v5421_v31 }
  0xf9   :  { %2259 = vmatprep.subr.msk.bf16.mxu1 %vm5417_vm11, %v5287_v23  ;;  %vm5457_vm11 = vnez %v5426_v34 }
  0xfa   :  { %2624 = vmatpush3.bf16.msk.msra.mxu0 %vm5444_vm9, %v5287_v23 }
  0xfb   :  { %1151 = vmatmul.mubr.bf16.gmra.mxu1 %v2735_v41  ;;  %2625 = vmatprep.subr.msk.bf16.mxu0 %vm5445_vm7, %v5287_v23 }
  0xfc   :  { %2261 = vmatpush1.bf16.msk.msra.mxu1 %vm5454_vm4, %v5287_v23  ;;  %1259 = vmatprep.mubr.bf16.mxu1 %v5281_v17  ;;  %vm5456_vm4 = vnez %v5356_v14 }
  0xfd   :  { %2263 = vmatprep.subr.msk.bf16.mxu1 %vm5455_vm14, %v5287_v23  ;;  %vm5458_vm14 = vnez %v5361_v19 }
  0xfe   :  { %2626 = vmatpush3.bf16.msk.msra.mxu0 %vm5445_vm7, %v5287_v23 }
  0xff   :  { %2627 = vmatprep.subr.msk.bf16.mxu0 %vm5456_vm4, %v5287_v23 }
 0x100   :  { %2265 = vmatpush1.bf16.msk.msra.mxu1 %vm5424_vm1, %v5287_v23  ;;  %vm5459_vm1 = vnez %v5431_v36 }
 0x101   :  { %2267 = vmatprep.subr.msk.bf16.mxu1 %vm5457_vm11, %v5287_v23 }
 0x102   :  { %2628 = vmatpush3.bf16.msk.msra.mxu0 %vm5456_vm4, %v5287_v23 }
 0x103   :  { %2629 = vmatprep.subr.msk.bf16.mxu0 %vm5458_vm14, %v5287_v23 }
 0x104   :  { %2269 = vmatpush1.bf16.msk.msra.mxu1 %vm5429_vm15, %v5287_v23 }
 0x105   :  { %2271 = vmatprep.subr.msk.bf16.mxu1 %vm5459_vm1, %v5287_v23 }
 0x106   :  { %2630 = vmatpush3.bf16.msk.msra.mxu0 %vm5458_vm14, %v5287_v23 }
 0x107   :  { %2631 = vmatprep.subr.msk.bf16.mxu0 %vm5449_vm0, %v5287_v23 }
 0x108   :  { %2273 = vmatpush1.bf16.msk.msra.mxu1 %vm5448_vm5, %v5287_v23  ;;  %vm5460_vm5 = vnez %v5330_v4 }
 0x109   :  { %2275 = vmatprep.subr.msk.bf16.mxu1 %vm5437_vm2, %v5287_v23 }
 0x10a   :  { %2632 = vmatpush3.bf16.msk.msra.mxu0 %vm5449_vm0, %v5287_v23 }
 0x10b   :  { %2633 = vmatprep.subr.msk.bf16.mxu0 %vm5451_vm6, %v5287_v23 }
 0x10c   :  { %2277 = vmatpush1.bf16.msk.msra.mxu1 %vm5450_vm13, %v5287_v23  ;;  %vm5461_vm13 = vnez %v5406_v21 }
 0x10d   :  { %2279 = vmatprep.subr.msk.bf16.mxu1 %vm5460_vm5, %v5287_v23 }
 0x10e   :  { %2634 = vmatpush3.bf16.msk.msra.mxu0 %vm5451_vm6, %v5287_v23 }
 0x10f   :  { %2639 = vmatprep.subr.msk.bf16.mxu0 %vm5442_vm8, %v5287_v23 }
 0x110   :  { %2281 = vmatpush1.bf16.msk.msra.mxu1 %vm5441_vm3, %v5287_v23  ;;  %vm5462_vm3 = vnez %v5411_v24  ;;  %v493_v49 = vpop.f32.mrf.mxu0 }
 0x111   :  { %2301 = vmatprep.subr.msk.bf16.mxu1 %vm5461_vm13, %v5287_v23  ;;  %2636 = vmatmul.mubr.bf16.vlgmr.msra.gmra.mxu0 %v2735_v41  ;;  %v4417_v43 = vpop.f32.mrf.mxu1 }
 0x112   :  { %2640 = vmatpush3.bf16.msk.msra.mxu0 %vm5442_vm8, %v5287_v23  ;;  %2655 = vmatprep.mubr.bf16.mxu0 %v2736_v42  ;;  %v495_v53 = vpop.f32.mrf.mxu0 }
 0x113   :  { %1260 = vmatmul.mubr.bf16.vlgmr.msra.gmra.mxu1 %v2736_v42  ;;  %2641 = vmatprep.subr.msk.bf16.mxu0 %vm5443_vm12, %v5287_v23  ;;  %v4432_v45 = vpop.f32.mrf.mxu1 }
 0x114   :  { %2303 = vmatpush1.bf16.msk.msra.mxu1 %vm5452_vm10, %v5287_v23  ;;  %1269 = vmatprep.mubr.bf16.mxu1 %v5281_v17  ;;  %vm5463_vm10 = vnez %v5413_v28  ;;  %v497_v55 = vpop.f32.mrf.mxu0 }
 0x115   :  { %2305 = vmatprep.subr.msk.bf16.mxu1 %vm5462_vm3, %v5287_v23  ;;  %vm5464_vm3 = vnez %v5416_v29  ;;  %v4446_v46 = vpop.f32.mrf.mxu1 }
 0x116   :  { %2642 = vmatpush3.bf16.msk.msra.mxu0 %vm5443_vm12, %v5287_v23  ;;  %vm5465_vm12 = vnez %v5418_v30  ;;  %v499_v59 = vpop.f32.mrf.mxu0 }
 0x117   :  { %2643 = vmatprep.subr.msk.bf16.mxu0 %vm5444_vm9, %v5287_v23  ;;  %v4461_v47 = vpop.f32.mrf.mxu1 }
 0x118   :  { %2307 = vmatpush1.bf16.msk.msra.mxu1 %vm5463_vm10, %v5287_v23  ;;  %vm5466_vm10 = vnez %v5421_v31  ;;  %v503_v62 = vpop.f32.mrf.mxu0 }
 0x119   :  { %2309 = vmatprep.subr.msk.bf16.mxu1 %vm5464_vm3, %v5287_v23  ;;  %vm5467_vm3 = vnez %v5423_v32  ;;  %v4475_v48 = vpop.f32.mrf.mxu1 }
 0x11a   :  { %2644 = vmatpush3.bf16.msk.msra.mxu0 %vm5444_vm9, %v5287_v23  ;;  %v505_v11 = vpop.f32.mrf.mxu0 }
 0x11b   :  { %1270 = vmatmul.mubr.bf16.gmra.mxu1 %v2737_v44  ;;  %2645 = vmatprep.subr.msk.bf16.mxu0 %vm5445_vm7, %v5287_v23  ;;  %v4489_v51 = vpop.f32.mrf.mxu1 }
 0x11c   :  { %2311 = vmatpush1.bf16.msk.msra.mxu1 %vm5465_vm12, %v5287_v23  ;;  %1394 = vmatprep.mubr.bf16.mxu1 %v5281_v17  ;;  %v507_v56 = vpop.f32.mrf.mxu0 }
 0x11d   :  { %2313 = vmatprep.subr.msk.bf16.mxu1 %vm5466_vm10, %v5287_v23  ;;  %v4503_v54 = vpop.f32.mrf.mxu1 }
 0x11e   :  { %2646 = vmatpush3.bf16.msk.msra.mxu0 %vm5445_vm7, %v5287_v23  ;;  %v509_v25 = vpop.f32.mrf.mxu0 }
 0x11f   :  { %2647 = vmatprep.subr.msk.bf16.mxu0 %vm5456_vm4, %v5287_v23  ;;  %v4517_v57 = vpop.f32.mrf.mxu1 }
 0x120   :  { %2315 = vmatpush1.bf16.msk.msra.mxu1 %vm5467_vm3, %v5287_v23 }
 0x121   :  { %2317 = vmatprep.subr.msk.bf16.mxu1 %vm5457_vm11, %v5287_v23  ;;  %vm5468_vm11 = vnez %v5433_v37 }
 0x122   :  { %2648 = vmatpush3.bf16.msk.msra.mxu0 %vm5456_vm4, %v5287_v23 }
 0x123   :  { %2649 = vmatprep.subr.msk.bf16.mxu0 %vm5458_vm14, %v5287_v23 }
 0x124   :  { %2319 = vmatpush1.bf16.msk.msra.mxu1 %vm5429_vm15, %v5287_v23 }
 0x125   :  { %2321 = vmatprep.subr.msk.bf16.mxu1 %vm5459_vm1, %v5287_v23  ;;  %vm5469_vm1 = vnez %v5327_v1 }
 0x126   :  { %2650 = vmatpush3.bf16.msk.msra.mxu0 %vm5458_vm14, %v5287_v23 }
 0x127   :  { %2651 = vmatprep.subr.msk.bf16.mxu0 %vm5449_vm0, %v5287_v23 }
 0x128   :  { %2323 = vmatpush1.bf16.msk.msra.mxu1 %vm5468_vm11, %v5287_v23 }
 0x129   :  { %2325 = vmatprep.subr.msk.bf16.mxu1 %vm5437_vm2, %v5287_v23  ;;  %vm5470_vm2 = vnez %v5333_v52 }
 0x12a   :  { %2652 = vmatpush3.bf16.msk.msra.mxu0 %vm5449_vm0, %v5287_v23 }
 0x12b   :  { %2653 = vmatprep.subr.msk.bf16.mxu0 %vm5451_vm6, %v5287_v23 }
 0x12c   :  { %2327 = vmatpush1.bf16.msk.msra.mxu1 %vm5469_vm1, %v5287_v23 }
 0x12d   :  { %2329 = vmatprep.subr.msk.bf16.mxu1 %vm5460_vm5, %v5287_v23  ;;  %vm5472_vm5 = vnez %v5343_v7 }
 0x12e   :  { %2654 = vmatpush3.bf16.msk.msra.mxu0 %vm5451_vm6, %v5287_v23 }
 0x12f   :  { %2659 = vmatprep.subr.msk.bf16.mxu0 %vm5442_vm8, %v5287_v23 }
 0x130   :  { %2331 = vmatpush1.bf16.msk.msra.mxu1 %vm5470_vm2, %v5287_v23  ;;  %vm5471_vm2 = vnez %v5408_v22 }
 0x131   :  { %2351 = vmatprep.subr.msk.bf16.mxu1 %vm5461_vm13, %v5287_v23  ;;  %2656 = vmatmul.mubr.bf16.vlgmr.msra.gmra.mxu0 %v2737_v44  ;;  %vm5473_vm13 = vnez %v5411_v24  ;;  %v4597_v40 = vpop.f32.mrf.mxu0  ;;  %v2740_v44 = vld [vmem:[#allocation7] sm:$0xff]  }
 0x132   :  { %2660 = vmatpush3.bf16.msk.msra.mxu0 %vm5442_vm8, %v5287_v23  ;;  %2675 = vmatprep.mubr.bf16.mxu0 %v2738_v58 }
 0x133   :  { %v660_v60 = vpop.f32.mrf.mxu1  ;;  %1395 = vmatmul.mubr.bf16.vlgmr.msra.gmra.mxu1 %v2738_v58  ;;  %2661 = vmatprep.subr.msk.bf16.mxu0 %vm5472_vm5, %v5287_v23  ;;  %v4611_v41 = vpop.f32.mrf.mxu0 }
 0x134   :  { %v4531_v61 = vadd.f32 %v660_v60, %v493_v49  ;;  %2353 = vmatpush1.bf16.msk.msra.mxu1 %vm5471_vm2, %v5287_v23  ;;  %1404 = vmatprep.mubr.bf16.mxu1 %v5281_v17  ;;  %vm5474_vm2 = vnez %v5413_v28 }
 0x135   :  { %v662_v63 = vpop.f32.mrf.mxu1  ;;  %2355 = vmatprep.subr.msk.bf16.mxu1 %vm5473_vm13, %v5287_v23  ;;  %vm5475_vm13 = vnez %v5416_v29  ;;  %v4625_v42 = vpop.f32.mrf.mxu0 }
 0x136   :  { %v4543_v3 = vadd.f32 %v662_v63, %v495_v53  ;;  %2662 = vmatpush3.bf16.msk.msra.mxu0 %vm5472_vm5, %v5287_v23 }
 0x137   :  { %v664_v5 = vpop.f32.mrf.mxu1  ;;  %2663 = vmatprep.subr.msk.bf16.mxu0 %vm5444_vm9, %v5287_v23  ;;  %v4639_v49 = vpop.f32.mrf.mxu0 }
 0x138   :  { %v4548_v9 = vadd.f32 %v664_v5, %v497_v55  ;;  %2357 = vmatpush1.bf16.msk.msra.mxu1 %vm5474_vm2, %v5287_v23  ;;  %v2743_v5 = vld [vmem:[#allocation7 + $0x28] sm:$0xff]  }
 0x139   :  { %v666_v12 = vpop.f32.mrf.mxu1  ;;  %2359 = vmatprep.subr.msk.bf16.mxu1 %vm5475_vm13, %v5287_v23 }
 0x13a   :  { %v4559_v13 = vadd.f32 %v666_v12, %v499_v59  ;;  %2664 = vmatpush3.bf16.msk.msra.mxu0 %vm5444_vm9, %v5287_v23 }
 0x13b   :  { %v670_v15 = vpop.f32.mrf.mxu1  ;;  %1405 = vmatmul.mubr.bf16.gmra.mxu1 %v2739_v6  ;;  %2665 = vmatprep.subr.msk.bf16.mxu0 %vm5445_vm7, %v5287_v23 }
 0x13c   :  { %v4564_v50 = vadd.f32 %v670_v15, %v503_v62  ;;  %2361 = vmatpush1.bf16.msk.msra.mxu1 %vm5465_vm12, %v5287_v23  ;;  %1508 = vmatprep.mubr.bf16.mxu1 %v5281_v17 }
 0x13d   :  { %v672_v2 = vpop.f32.mrf.mxu1  ;;  %2363 = vmatprep.subr.msk.bf16.mxu1 %vm5466_vm10, %v5287_v23  ;;  %vm5476_vm10 = vnez %v5426_v34 }
 0x13e   :  { %v4576_v27 = vadd.f32 %v672_v2, %v505_v11  ;;  %2666 = vmatpush3.bf16.msk.msra.mxu0 %vm5445_vm7, %v5287_v23 }
 0x13f   :  { %v674_v16 = vpop.f32.mrf.mxu1  ;;  %2667 = vmatprep.subr.msk.bf16.mxu0 %vm5456_vm4, %v5287_v23 }
 0x140   :  { %v4581_v18 = vadd.f32 %v674_v16, %v507_v56  ;;  %2365 = vmatpush1.bf16.msk.msra.mxu1 %vm5467_vm3, %v5287_v23  ;;  %vm5477_vm3 = vnez %v5431_v36  ;;  %v2742_v36 = vld [vmem:[#allocation7 + $0x20] sm:$0xff]  }
 0x141   :  { %v676_v39 = vpop.f32.mrf.mxu1  ;;  %2367 = vmatprep.subr.msk.bf16.mxu1 %vm5476_vm10, %v5287_v23 }
 0x142   :  { %v4592_v0 = vadd.f32 %v676_v39, %v509_v25  ;;  %2668 = vmatpush3.bf16.msk.msra.mxu0 %vm5456_vm4, %v5287_v23 }
 0x143   :  { %2669 = vmatprep.subr.msk.bf16.mxu0 %vm5458_vm14, %v5287_v23 }
 0x144   :  { %2369 = vmatpush1.bf16.msk.msra.mxu1 %vm5429_vm15, %v5287_v23  ;;  %vm5478_vm15 = vnez %v5436_v38 }
 0x145   :  { %2371 = vmatprep.subr.msk.bf16.mxu1 %vm5477_vm3, %v5287_v23 }
 0x146   :  { %2670 = vmatpush3.bf16.msk.msra.mxu0 %vm5458_vm14, %v5287_v23 }
 0x147   :  { %2671 = vmatprep.subr.msk.bf16.mxu0 %vm5449_vm0, %v5287_v23 }
 0x148   :  { %2373 = vmatpush1.bf16.msk.msra.mxu1 %vm5468_vm11, %v5287_v23  ;;  %vm5479_vm11 = vnez %v5330_v4 }
 0x149   :  { %2375 = vmatprep.subr.msk.bf16.mxu1 %vm5478_vm15, %v5287_v23  ;;  %vm5480_vm15 = vnez %v5333_v52 }
 0x14a   :  { %2672 = vmatpush3.bf16.msk.msra.mxu0 %vm5449_vm0, %v5287_v23 }
 0x14b   :  { %2673 = vmatprep.subr.msk.bf16.mxu0 %vm5451_vm6, %v5287_v23 }
 0x14c   :  { %2377 = vmatpush1.bf16.msk.msra.mxu1 %vm5469_vm1, %v5287_v23  ;;  %vm5481_vm1 = vnez %v5406_v21 }
 0x14d   :  { %2379 = vmatprep.subr.msk.bf16.mxu1 %vm5479_vm11, %v5287_v23 }
 0x14e   :  { %2674 = vmatpush3.bf16.msk.msra.mxu0 %vm5451_vm6, %v5287_v23 }
 0x14f   :  { %2679 = vmatprep.subr.msk.bf16.mxu0 %vm5442_vm8, %v5287_v23 }
 0x150   :  { %2381 = vmatpush1.bf16.msk.msra.mxu1 %vm5480_vm15, %v5287_v23  ;;  %vm5482_vm15 = vnez %v5408_v22  ;;  %v2741_v22 = vld [vmem:[#allocation7 + $0x8] sm:$0xff]  }
 0x151   :  { %2401 = vmatprep.subr.msk.bf16.mxu1 %vm5481_vm1, %v5287_v23  ;;  %v713_v53 = vpop.f32.mrf.mxu0  ;;  %2676 = vmatmul.mubr.bf16.vlgmr.msra.gmra.mxu0 %v2739_v6  ;;  %vm5483_vm1 = vnez %v5411_v24 }
 0x152   :  { %v4651_v55 = vadd.f32 %v713_v53, %v4417_v43  ;;  %2680 = vmatpush3.bf16.msk.msra.mxu0 %vm5442_vm8, %v5287_v23  ;;  %2695 = vmatprep.mubr.bf16.mxu0 %v2740_v44 }
 0x153   :  { %1509 = vmatmul.mubr.bf16.vlgmr.msra.gmra.mxu1 %v2740_v44  ;;  %v715_v58 = vpop.f32.mrf.mxu0  ;;  %2681 = vmatprep.subr.msk.bf16.mxu0 %vm5472_vm5, %v5287_v23 }
 0x154   :  { %2403 = vmatpush1.bf16.msk.msra.mxu1 %vm5482_vm15, %v5287_v23  ;;  %v4663_v21 = vadd.f32 %v715_v58, %v4432_v45  ;;  %1518 = vmatprep.mubr.bf16.mxu1 %v5281_v17  ;;  %vm5484_vm15 = vnez %v5421_v31 }
 0x155   :  { %2405 = vmatprep.subr.msk.bf16.mxu1 %vm5483_vm1, %v5287_v23  ;;  %v717_v43 = vpop.f32.mrf.mxu0  ;;  %vm5490_vm1 = vnez %v5333_v52 }
 0x156   :  { %v4670_v59 = vadd.f32 %v717_v43, %v4446_v46  ;;  %2682 = vmatpush3.bf16.msk.msra.mxu0 %vm5472_vm5, %v5287_v23 }
 0x157   :  { %v719_v45 = vpop.f32.mrf.mxu0  ;;  %2683 = vmatprep.subr.msk.bf16.mxu0 %vm5444_vm9, %v5287_v23 }
 0x158   :  { %2407 = vmatpush1.bf16.msk.msra.mxu1 %vm5474_vm2, %v5287_v23  ;;  %v4682_v24 = vadd.f32 %v719_v45, %v4461_v47  ;;  %vm5486_vm2 = vnez %v5428_v35 }
 0x159   :  { %2409 = vmatprep.subr.msk.bf16.mxu1 %vm5475_vm13, %v5287_v23  ;;  %v723_v46 = vpop.f32.mrf.mxu0  ;;  %vm5485_vm13 = vnez %v5423_v32  ;;  %v4733_v32 = vpop.f32.mrf.mxu1 }
 0x15a   :  { %v4688_v60 = vadd.f32 %v723_v46, %v4475_v48  ;;  %2684 = vmatpush3.bf16.msk.msra.mxu0 %vm5444_vm9, %v5287_v23  ;;  %v775_v20 = vadd.f32 %v4733_v32, %v4597_v40 }
 0x15b   :  { %1519 = vmatmul.mubr.bf16.gmra.mxu1 %v2741_v22  ;;  %v725_v28 = vpop.f32.mrf.mxu0  ;;  %2685 = vmatprep.subr.msk.bf16.mxu0 %vm5445_vm7, %v5287_v23  ;;  %v4747_v34 = vpop.f32.mrf.mxu1 }
 0x15c   :  { %2411 = vmatpush1.bf16.msk.msra.mxu1 %vm5465_vm12, %v5287_v23  ;;  %v4700_v29 = vadd.f32 %v725_v28, %v4489_v51  ;;  %1627 = vmatprep.mubr.bf16.mxu1 %v5281_v17  ;;  %vm5488_vm12 = vnez %v5436_v38 }
 0x15d   :  { %2413 = vmatprep.subr.msk.bf16.mxu1 %vm5484_vm15, %v5287_v23  ;;  %v727_v47 = vpop.f32.mrf.mxu0  ;;  %v4761_v35 = vpop.f32.mrf.mxu1 }
 0x15e   :  { %v4707_v48 = vadd.f32 %v727_v47, %v4503_v54  ;;  %2686 = vmatpush3.bf16.msk.msra.mxu0 %vm5445_vm7, %v5287_v23  ;;  %v778_v26 = vadd.f32 %v4761_v35, %v4625_v42 }
 0x15f   :  { %v729_v30 = vpop.f32.mrf.mxu0  ;;  %2687 = vmatprep.subr.msk.bf16.mxu0 %vm5456_vm4, %v5287_v23 }
 0x160   :  { %2415 = vmatpush1.bf16.msk.msra.mxu1 %vm5485_vm13, %v5287_v23  ;;  %v4719_v31 = vadd.f32 %v729_v30, %v4517_v57 }
 0x161   :  { %2417 = vmatprep.subr.msk.bf16.mxu1 %vm5476_vm10, %v5287_v23  ;;  %vm5487_vm10 = vnez %v5433_v37 }
 0x162   :  { %2688 = vmatpush3.bf16.msk.msra.mxu0 %vm5456_vm4, %v5287_v23 }
 0x163   :  { %2689 = vmatprep.subr.msk.bf16.mxu0 %vm5458_vm14, %v5287_v23 }
 0x164   :  { %2419 = vmatpush1.bf16.msk.msra.mxu1 %vm5486_vm2, %v5287_v23 }
 0x165   :  { %2421 = vmatprep.subr.msk.bf16.mxu1 %vm5477_vm3, %v5287_v23  ;;  %vm5489_vm3 = vnez %v5327_v1  ;;  %v769_v1 = vpop.f32.mrf.mxu1 }
 0x166   :  { %2690 = vmatpush3.bf16.msk.msra.mxu0 %vm5458_vm14, %v5287_v23 }
 0x167   :  { %2691 = vmatprep.subr.msk.bf16.mxu0 %vm5449_vm0, %v5287_v23 }
 0x168   :  { %2423 = vmatpush1.bf16.msk.msra.mxu1 %vm5487_vm10, %v5287_v23 }
 0x169   :  { %2425 = vmatprep.subr.msk.bf16.mxu1 %vm5488_vm12, %v5287_v23 }
 0x16a   :  { %2692 = vmatpush3.bf16.msk.msra.mxu0 %vm5449_vm0, %v5287_v23 }
 0x16b   :  { %2693 = vmatprep.subr.msk.bf16.mxu0 %vm5451_vm6, %v5287_v23 }
 0x16c   :  { %2427 = vmatpush1.bf16.msk.msra.mxu1 %vm5489_vm3, %v5287_v23 }
 0x16d   :  { %2429 = vmatprep.subr.msk.bf16.mxu1 %vm5479_vm11, %v5287_v23 }
 0x16e   :  { %2694 = vmatpush3.bf16.msk.msra.mxu0 %vm5451_vm6, %v5287_v23 }
 0x16f   :  { %2699 = vmatprep.subr.msk.bf16.mxu0 %vm5442_vm8, %v5287_v23 }
 0x170   :  { %2431 = vmatpush1.bf16.msk.msra.mxu1 %vm5490_vm1, %v5287_v23 }
 0x171   :  { %v832_v37 = vpop.f32.mrf.mxu0  ;;  %2696 = vmatmul.mubr.bf16.vlgmr.msra.gmra.mxu0 %v2741_v22 }
 0x172   :  { %v4776_v38 = vadd.f32 %v832_v37, %v4531_v61  ;;  %2700 = vmatpush3.bf16.msk.msra.mxu0 %vm5442_vm8, %v5287_v23  ;;  %2715 = vmatprep.mubr.bf16.mxu0 %v2742_v36 }
 0x173   :  { %v885_v4 = vpop.f32.mrf.mxu1  ;;  %1628 = vmatmul.mubr.bf16.vlgmr.msra.gmra.mxu1 %v2742_v36  ;;  %v834_v52 = vpop.f32.mrf.mxu0  ;;  %2701 = vmatprep.subr.msk.bf16.mxu0 %vm5472_vm5, %v5287_v23 }
 0x174   :  { %v4782_v51 = vadd.f32 %v885_v4, %v4651_v55  ;;  %1637 = vmatprep.mubr.bf16.mxu1 %v5281_v17  ;;  %v4789_v54 = vadd.f32 %v834_v52, %v4543_v3 }
 0x175   :  { %v887_v57 = vpop.f32.mrf.mxu1  ;;  %v836_v33 = vpop.f32.mrf.mxu0 }
 0x176   :  { %v4792_v61 = vadd.f32 %v887_v57, %v4663_v21  ;;  %v4795_v62 = vadd.f32 %v836_v33, %v4548_v9  ;;  %2702 = vmatpush3.bf16.msk.msra.mxu0 %vm5472_vm5, %v5287_v23  ;;  %v770_v21 = vadd.f32 %v769_v1, %v4639_v49  ;;  %v5491_v57 = vlaneseq }
 0x177   :  { %v889_v63 = vpop.f32.mrf.mxu1  ;;  %v838_v3 = vpop.f32.mrf.mxu0  ;;  %2703 = vmatprep.subr.msk.bf16.mxu0 %vm5444_vm9, %v5287_v23 }
 0x178   :  { %v4801_v17 = vadd.f32 %v889_v63, %v4670_v59  ;;  %v4807_v6 = vadd.f32 %v838_v3, %v4559_v13 }
 0x179   :  { %v891_v11 = vpop.f32.mrf.mxu1  ;;  %v842_v12 = vpop.f32.mrf.mxu0 }
 0x17a   :  { %v4810_v9 = vadd.f32 %v891_v11, %v4682_v24  ;;  %v4813_v7 = vadd.f32 %v842_v12, %v4564_v50  ;;  %2704 = vmatpush3.bf16.msk.msra.mxu0 %vm5444_vm9, %v5287_v23 }
 0x17b   :  { %v895_v15 = vpop.f32.mrf.mxu1  ;;  %1638 = vmatmul.mubr.bf16.gmra.mxu1 %v2743_v5  ;;  %v844_v2 = vpop.f32.mrf.mxu0  ;;  %2705 = vmatprep.subr.msk.bf16.mxu0 %vm5445_vm7, %v5287_v23 }
 0x17c   :  { %v4819_v56 = vadd.f32 %v895_v15, %v4688_v60  ;;  %v4825_v13 = vadd.f32 %v844_v2, %v4576_v27 }
 0x17d   :  { %v897_v16 = vpop.f32.mrf.mxu1  ;;  %v846_v25 = vpop.f32.mrf.mxu0 }
 0x17e   :  { %v4828_v50 = vadd.f32 %v897_v16, %v4700_v29  ;;  %v4831_v39 = vadd.f32 %v846_v25, %v4581_v18  ;;  %2706 = vmatpush3.bf16.msk.msra.mxu0 %vm5445_vm7, %v5287_v23 }
 0x17f   :  { %v899_v8 = vpop.f32.mrf.mxu1  ;;  %v848_v53 = vpop.f32.mrf.mxu0  ;;  %2707 = vmatprep.subr.msk.bf16.mxu0 %vm5456_vm4, %v5287_v23 }
 0x180   :  { %v4837_v44 = vadd.f32 %v899_v8, %v4707_v48  ;;  %v4843_v27 = vadd.f32 %v848_v53, %v4592_v0  ;;  %v767_v0 = vadd.f32 %v4747_v34, %v4611_v41 }
 0x181   :  { %v901_v55 = vpop.f32.mrf.mxu1 }
 0x182   :  { %v4846_v18 = vadd.f32 %v901_v55, %v4719_v31  ;;  %2708 = vmatpush3.bf16.msk.msra.mxu0 %vm5456_vm4, %v5287_v23 }
 0x183   :  { %2709 = vmatprep.subr.msk.bf16.mxu0 %vm5458_vm14, %v5287_v23 }
 0x186   :  { %2710 = vmatpush3.bf16.msk.msra.mxu0 %vm5458_vm14, %v5287_v23  ;;  %vm4877_vm14 = vcmp.lt.s32.totalorder %v5491_v57, 128 }
 0x187   :  { %2711 = vmatprep.subr.msk.bf16.mxu0 %vm5449_vm0, %v5287_v23 }
 0x18a   :  { %2712 = vmatpush3.bf16.msk.msra.mxu0 %vm5449_vm0, %v5287_v23 }
 0x18b   :  { %2713 = vmatprep.subr.msk.bf16.mxu0 %vm5451_vm6, %v5287_v23 }
 0x18e   :  { %2714 = vmatpush3.bf16.msk.msra.mxu0 %vm5451_vm6, %v5287_v23 }
 0x191   :  { %v2597_v10 = vpop.f32.mrf.mxu0  ;;  %2716 = vmatmul.mubr.bf16.vlgmr.msra.gmra.mxu0 %v2743_v5 }
 0x192   :  { %v967_v23 = vadd.f32 %v2597_v10, %v775_v20 }
 0x193   :  { %v1028_v14 = vpop.f32.mrf.mxu1  ;;  %v938_v19 = vpop.f32.mrf.mxu0 }
 0x194   :  { %v957_v43 = vadd.f32 %v938_v19, %v767_v0  ;;  %v1800_v29 = vmul.f32 %v967_v23, %v967_v23 }
 0x195   :  { %v2598_v58 = vpop.f32.mrf.mxu0  ;;  %v1030_v59 = vpop.f32.mrf.mxu1 }
 0x196   :  { %v1798_v24 = vmul.f32 %v957_v43, %v957_v43  ;;  %v972_v46 = vadd.f32 %v2598_v58, %v778_v26 }
 0x197   :  { %v941_v22 = vpop.f32.mrf.mxu0  ;;  %v1032_v28 = vpop.f32.mrf.mxu1 }
 0x198   :  { %v962_v45 = vadd.f32 %v941_v22, %v770_v21  ;;  %v1801_v47 = vmul.f32 %v972_v46, %v972_v46 }
 0x199   :  { %v1034_v30 = vpop.f32.mrf.mxu1 }
 0x19a   :  { %v1799_v60 = vmul.f32 %v962_v45, %v962_v45 }
 0x19b   :  { %v1038_v49 = vpop.f32.mrf.mxu1 }
 0x19c   :  { %v1802_v41 = vadd.f32 %v1799_v60, %v1798_v24 }
 0x19d   :  { %v1040_v36 = vpop.f32.mrf.mxu1 }
 0x19e   :  { %v1803_v48 = vadd.f32 %v1802_v41, %v1800_v29 }
 0x19f   :  { %v1042_v42 = vpop.f32.mrf.mxu1 }
 0x1a0   :  { %v1804_v40 = vadd.f32 %v1803_v48, %v1801_v47 }
 0x1a1   :  { %v1044_v52 = vpop.f32.mrf.mxu1 }
 0x1a2   :  { %v1805_v31 = vrot.slane %v1804_v40, 4 }
 0x1a4   :  { %v1806_v32 = vadd.f32 %v1805_v31, %v1804_v40 }
 0x1a6   :  { %v1807_v34 = vrot.slane %v1806_v32, 2 }
 0x1a8   :  { %v1808_v1 = vadd.f32 %v1807_v34, %v1806_v32 }
 0x1aa   :  { %v1809_v37 = vrot.slane %v1808_v1, 1 }
 0x1ac   :  { %v1810_v35 = vadd.f32 %v1809_v37, %v1808_v1 }
 0x1ae   :  { %v2448_v4 = vadd.f32 -1.0, %v1810_v35 }
 0x1b0   :  { %v1812_v63 = vmul.f32 %v2448_v4, %v2448_v4 }
 0x1b2   :  { %1893 = vst.msk [vmem:[%s4969_s6 + $0x2] sm:$0x1] %vm4877_vm14, %v1812_v63 }
 0x1b3   :  { %v1142_v5 = vpop.f32.mrf.mxu1 }
 0x1b4   :  { %v1143_v3 = vadd.f32 %v1142_v5, %v1028_v14 }
 0x1b5   :  { %v1144_v11 = vpop.f32.mrf.mxu1 }
 0x1b6   :  { %v1145_v12 = vadd.f32 %v1144_v11, %v1030_v59 }
 0x1b7   :  { %v1146_v15 = vpop.f32.mrf.mxu1 }
 0x1b8   :  { %v1147_v2 = vadd.f32 %v1146_v15, %v1032_v28 }
 0x1b9   :  { %v1148_v16 = vpop.f32.mrf.mxu1 }
 0x1ba   :  { %v1149_v25 = vadd.f32 %v1148_v16, %v1034_v30 }
 0x1bb   :  { %v1152_v8 = vpop.f32.mrf.mxu1 }
 0x1bc   :  { %v1153_v53 = vadd.f32 %v1152_v8, %v1038_v49 }
 0x1bd   :  { %v1154_v55 = vpop.f32.mrf.mxu1 }
 0x1be   :  { %v1155_v10 = vadd.f32 %v1154_v55, %v1040_v36 }
 0x1bf   :  { %v1156_v19 = vpop.f32.mrf.mxu1 }
 0x1c1   :  { %v1158_v0 = vpop.f32.mrf.mxu1 }
 0x1c2   :  { %v1159_v34 = vadd.f32 %v1158_v0, %v1044_v52 }
 0x1d3   :  { %v1261_v58 = vpop.f32.mrf.mxu1 }
 0x1d4   :  { %v1329_v20 = vadd.f32 %v1261_v58, %v1143_v3 }
 0x1d5   :  { %v1263_v21 = vpop.f32.mrf.mxu1 }
 0x1d6   :  { %v1709_v43 = vsub.f32 1.0, %v1329_v20  ;;  %v1330_v22 = vadd.f32 %v1263_v21, %v1145_v12  ;;  %v4898_v20 = vpop.f32.mrf.mxu0 }
 0x1d7   :  { %v1265_v26 = vpop.f32.mrf.mxu1 }
 0x1d8   :  { %v1717_v14 = vmul.f32 %v1709_v43, %v4776_v38  ;;  %v1710_v23 = vsub.f32 1.0, %v1330_v22  ;;  %v1332_v59 = vadd.f32 %v1265_v26, %v1147_v2  ;;  %v1157_v38 = vadd.f32 %v1156_v19, %v1042_v42  ;;  %v1081_v43 = vpop.f32.mrf.mxu0 }
 0x1d9   :  { %v1267_v45 = vpop.f32.mrf.mxu1 }
 0x1da   :  { %v1718_v24 = vmul.f32 %v1710_v23, %v4789_v54  ;;  %v1711_v46 = vsub.f32 1.0, %v1332_v59  ;;  %v1333_v60 = vadd.f32 %v1267_v45, %v1149_v25  ;;  %v1741_v48 = vmul.f32 %v1717_v14, %v1717_v14  ;;  %v4900_v22 = vpop.f32.mrf.mxu0 }
 0x1db   :  { %v1271_v28 = vpop.f32.mrf.mxu1 }
 0x1dc   :  { %v1719_v29 = vmul.f32 %v1711_v46, %v4795_v62  ;;  %v1712_v41 = vsub.f32 1.0, %v1333_v60  ;;  %v1335_v47 = vadd.f32 %v1271_v28, %v1153_v53  ;;  %v1742_v36 = vmul.f32 %v1718_v24, %v1718_v24  ;;  %v1084_v26 = vpop.f32.mrf.mxu0 }
 0x1dd   :  { %v1273_v30 = vpop.f32.mrf.mxu1 }
 0x1de   :  { %v1743_v40 = vmul.f32 %v1719_v29, %v1719_v29  ;;  %v1720_v31 = vmul.f32 %v1712_v41, %v4807_v6  ;;  %v1713_v49 = vsub.f32 1.0, %v1335_v47  ;;  %v1336_v32 = vadd.f32 %v1273_v30, %v1155_v10  ;;  %v4902_v14 = vpop.f32.mrf.mxu0 }
 0x1df   :  { %v1275_v1 = vpop.f32.mrf.mxu1 }
 0x1e0   :  { %v1749_v37 = vadd.f32 %v1743_v40, %v1741_v48  ;;  %v1744_v54 = vmul.f32 %v1720_v31, %v1720_v31  ;;  %v1721_v35 = vmul.f32 %v1713_v49, %v4813_v7  ;;  %v1714_v4 = vsub.f32 1.0, %v1336_v32  ;;  %v1195_v59 = vpop.f32.mrf.mxu0 }
 0x1e1   :  { %v1338_v57 = vadd.f32 %v1275_v1, %v1157_v38  ;;  %v1277_v62 = vpop.f32.mrf.mxu1 }
 0x1e2   :  { %v1758_v63 = vadd.f32 %v1744_v54, %v1742_v36  ;;  %v1745_v5 = vmul.f32 %v1721_v35, %v1721_v35  ;;  %v1722_v3 = vmul.f32 %v1714_v4, %v4825_v13  ;;  %v1339_v11 = vadd.f32 %v1277_v62, %v1159_v34  ;;  %v4904_v24 = vpop.f32.mrf.mxu0 }
 0x1e3   :  { %v1715_v12 = vsub.f32 1.0, %v1338_v57 }
 0x1e4   :  { %v1750_v6 = vadd.f32 %v1749_v37, %v1745_v5  ;;  %v1746_v15 = vmul.f32 %v1722_v3, %v1722_v3  ;;  %v1716_v2 = vsub.f32 1.0, %v1339_v11  ;;  %v1198_v28 = vpop.f32.mrf.mxu0 }
 0x1e5   :  { %v1723_v42 = vmul.f32 %v1715_v12, %v4831_v39 }
 0x1e6   :  { %v1759_v52 = vadd.f32 %v1758_v63, %v1746_v15  ;;  %v1724_v16 = vmul.f32 %v1716_v2, %v4843_v27 }
 0x1e7   :  { %v1747_v25 = vmul.f32 %v1723_v42, %v1723_v42 }
 0x1e8   :  { %v1748_v8 = vmul.f32 %v1724_v16, %v1724_v16 }
 0x1e9   :  { %v4894_v7 = vadd.f32 %v1750_v6, %v1747_v25 }
 0x1ea   :  { %v4896_v53 = vadd.f32 %v1759_v52, %v1748_v8 }
 0x1f1   :  { %v4906_v29 = vpop.f32.mrf.mxu0 }
 0x1f3   :  { %v1396_v55 = vpop.f32.mrf.mxu1  ;;  %v1314_v47 = vpop.f32.mrf.mxu0 }
 0x1f5   :  { %v1398_v10 = vpop.f32.mrf.mxu1  ;;  %v4908_v30 = vpop.f32.mrf.mxu0 }
 0x1f7   :  { %v1400_v19 = vpop.f32.mrf.mxu1  ;;  %v1317_v32 = vpop.f32.mrf.mxu0 }
 0x1f9   :  { %v1402_v13 = vpop.f32.mrf.mxu1 }
 0x1fb   :  { %v1406_v0 = vpop.f32.mrf.mxu1 }
 0x1fd   :  { %v1408_v58 = vpop.f32.mrf.mxu1 }
 0x1ff   :  { %v1410_v21 = vpop.f32.mrf.mxu1 }
 0x201   :  { %v1412_v39 = vpop.f32.mrf.mxu1 }
 0x211   :  { %v4910_v1 = vpop.f32.mrf.mxu0 }
 0x213   :  { %v1510_v27 = vpop.f32.mrf.mxu1  ;;  %v4913_v11 = vpop.f32.mrf.mxu0 }
 0x214   :  { %v1511_v31 = vadd.f32 %v1510_v27, %v1396_v55  ;;  %v1196_v55 = vadd.f32 %v1195_v59, %v1081_v43  ;;  %v1761_v59 = vrot.slane %v4896_v53, 4 }
 0x215   :  { %v1512_v23 = vpop.f32.mrf.mxu1  ;;  %v4917_v27 = vpop.f32.mrf.mxu0 }
 0x216   :  { %v1513_v38 = vadd.f32 %v1512_v23, %v1398_v10  ;;  %v1199_v10 = vadd.f32 %v1198_v28, %v1084_v26  ;;  %v1752_v26 = vrot.slane %v4894_v7, 4  ;;  %v1331_v28 = vadd.f32 %v1314_v47, %v1196_v55 }
 0x217   :  { %v1514_v45 = vpop.f32.mrf.mxu1 }
 0x218   :  { %v1515_v37 = vadd.f32 %v1514_v45, %v1400_v19  ;;  %v1753_v47 = vadd.f32 %v1752_v26, %v4894_v7 }
 0x219   :  { %v1516_v46 = vpop.f32.mrf.mxu1 }
 0x21a   :  { %v1517_v57 = vadd.f32 %v1516_v46, %v1402_v13  ;;  %v1334_v46 = vadd.f32 %v1317_v32, %v1199_v10  ;;  %v1754_v7 = vrot.slane %v1753_v47, 2 }
 0x21b   :  { %v1520_v60 = vpop.f32.mrf.mxu1 }
 0x21c   :  { %v1521_v12 = vadd.f32 %v1520_v60, %v1406_v0 }
 0x21d   :  { %v1522_v41 = vpop.f32.mrf.mxu1 }
 0x21e   :  { %v1523_v52 = vadd.f32 %v1522_v41, %v1408_v58 }
 0x21f   :  { %v1524_v48 = vpop.f32.mrf.mxu1 }
 0x220   :  { %v1525_v60 = vadd.f32 %v1524_v48, %v1410_v21  ;;  %v1204_v48 = vadd.f32 %v4902_v14, %v4898_v20 }
 0x221   :  { %v1526_v40 = vpop.f32.mrf.mxu1 }
 0x233   :  { %v1629_v49 = vpop.f32.mrf.mxu1 }
 0x234   :  { %v1697_v34 = vadd.f32 %v1629_v49, %v1511_v31 }
 0x235   :  { %v1631_v36 = vpop.f32.mrf.mxu1 }
 0x236   :  { %v1725_v54 = vsub.f32 1.0, %v1697_v34  ;;  %v1698_v35 = vadd.f32 %v1631_v36, %v1513_v38 }
 0x237   :  { %v1633_v4 = vpop.f32.mrf.mxu1 }
 0x238   :  { %v1726_v62 = vsub.f32 1.0, %v1698_v35  ;;  %v1700_v63 = vadd.f32 %v1633_v4, %v1515_v37  ;;  %v1733_v5 = vmul.f32 %v1725_v54, %v4782_v51  ;;  %v1857_v37 = vand.u32 2147483647, %v1334_v46 }
 0x239   :  { %v1635_v3 = vpop.f32.mrf.mxu1 }
 0x23a   :  { %v1727_v6 = vsub.f32 1.0, %v1700_v63  ;;  %v1701_v15 = vadd.f32 %v1635_v3, %v1517_v57  ;;  %v1734_v2 = vmul.f32 %v1726_v62, %v4792_v61  ;;  %v1767_v19 = vmul.f32 %v1733_v5, %v1733_v5 }
 0x23b   :  { %v1639_v42 = vpop.f32.mrf.mxu1  ;;  %v1527_v61 = vadd.f32 %v1526_v40, %v1412_v39  ;;  %v1814_v40 = vsub.f32 1.0, %v1334_v46  ;;  %v1762_v62 = vadd.f32 %v1761_v59, %v4896_v53  ;;  %v1337_v63 = vadd.f32 %v4906_v29, %v1204_v48 }
 0x23c   :  { %v1735_v16 = vmul.f32 %v1727_v6, %v4801_v17  ;;  %v1728_v25 = vsub.f32 1.0, %v1701_v15  ;;  %v1703_v8 = vadd.f32 %v1639_v42, %v1521_v12  ;;  %v1768_v31 = vmul.f32 %v1734_v2, %v1734_v2 }
 0x23d   :  { %v1641_v13 = vpop.f32.mrf.mxu1  ;;  %v1856_v3 = vand.u32 2147483647, %v1331_v28  ;;  %v1207_v6 = vadd.f32 %v4904_v24, %v4900_v22  ;;  %v1818_v15 = vmul.f32 %v1814_v40, %v1334_v46  ;;  %v1815_v53 = vsub.f32 1.0, %v1337_v63 }
 0x23e   :  { %v1769_v51 = vmul.f32 %v1735_v16, %v1735_v16  ;;  %v1736_v23 = vmul.f32 %v1728_v25, %v4810_v9  ;;  %v1729_v0 = vsub.f32 1.0, %v1703_v8  ;;  %v1704_v45 = vadd.f32 %v1641_v13, %v1523_v52  ;;  %v4923_v9 = vpop.f32.mrf.mxu0 }
 0x23f   :  { %v1643_v58 = vpop.f32.mrf.mxu1  ;;  %v1860_v2 = vadd.f32 %v1857_v37, %v1856_v3  ;;  %v1763_v16 = vrot.slane %v1762_v62, 2  ;;  %v1858_v29 = vand.u32 2147483647, %v1337_v63  ;;  %v1819_v24 = vmul.f32 %v1815_v53, %v1337_v63 }
 0x240   :  { %v1775_v41 = vadd.f32 %v1769_v51, %v1767_v19  ;;  %v1770_v17 = vmul.f32 %v1736_v23, %v1736_v23  ;;  %v1737_v49 = vmul.f32 %v1729_v0, %v4819_v56  ;;  %v1730_v43 = vsub.f32 1.0, %v1704_v45  ;;  %v2697_v54 = vpop.f32.mrf.mxu0 }
 0x241   :  { %v1706_v38 = vadd.f32 %v1643_v58, %v1525_v60  ;;  %v1645_v34 = vpop.f32.mrf.mxu1  ;;  %v1830_v19 = vmul.f32 %v1818_v15, %v1818_v15  ;;  %v1755_v23 = vadd.f32 %v1754_v7, %v1753_v47  ;;  %v1764_v22 = vadd.f32 %v1763_v16, %v1762_v62 }
 0x242   :  { %v1784_v36 = vadd.f32 %v1770_v17, %v1768_v31  ;;  %v1771_v32 = vmul.f32 %v1737_v49, %v1737_v49  ;;  %v1738_v21 = vmul.f32 %v1730_v43, %v4828_v50  ;;  %v1707_v39 = vadd.f32 %v1645_v34, %v1527_v61  ;;  %v1563_v42 = vpop.f32.mrf.mxu0 }
 0x243   :  { %v1731_v56 = vsub.f32 1.0, %v1706_v38  ;;  %v1813_v50 = vsub.f32 1.0, %v1331_v28  ;;  %v1765_v26 = vrot.slane %v1764_v22, 1  ;;  %v1831_v59 = vmul.f32 %v1819_v24, %v1819_v24 }
 0x244   :  { %v1776_v35 = vadd.f32 %v1775_v41, %v1771_v32  ;;  %v1772_v4 = vmul.f32 %v1738_v21, %v1738_v21  ;;  %v1732_v57 = vsub.f32 1.0, %v1707_v39  ;;  %v2698_v13 = vpop.f32.mrf.mxu0  ;;  %v1564_v32 = vadd.f32 %v1563_v42, %v4913_v11 }
 0x245   :  { %v1739_v5 = vmul.f32 %v1731_v56, %v4837_v44  ;;  %v1817_v8 = vmul.f32 %v1813_v50, %v1331_v28  ;;  %v1340_v44 = vadd.f32 %v4908_v30, %v1207_v6  ;;  %v1756_v30 = vrot.slane %v1755_v23, 1 }
 0x246   :  { %v1785_v12 = vadd.f32 %v1784_v36, %v1772_v4  ;;  %v1740_v20 = vmul.f32 %v1732_v57, %v4846_v18  ;;  %v1861_v18 = vadd.f32 %v1860_v2, %v1858_v29  ;;  %v1566_v17 = vpop.f32.mrf.mxu0  ;;  %v1572_v36 = vadd.f32 %v2697_v54, %v4910_v1 }
 0x247   :  { %v1773_v14 = vmul.f32 %v1739_v5, %v1739_v5  ;;  %v1829_v45 = vmul.f32 %v1817_v8, %v1817_v8  ;;  %v1816_v46 = vsub.f32 1.0, %v1340_v44  ;;  %v1859_v60 = vand.u32 2147483647, %v1340_v44 }
 0x248   :  { %v1774_v52 = vmul.f32 %v1740_v20, %v1740_v20  ;;  %v1757_v37 = vadd.f32 %v1756_v30, %v1755_v23  ;;  %v1766_v47 = vadd.f32 %v1765_v26, %v1764_v22  ;;  %v1575_v63 = vadd.f32 %v2698_v13, %v4917_v27 }
 0x249   :  { %v1777_v25 = vadd.f32 %v1776_v35, %v1773_v14  ;;  %v1833_v58 = vadd.f32 %v1830_v19, %v1829_v45  ;;  %v1862_v41 = vadd.f32 %v1861_v18, %v1859_v60  ;;  %v1820_v28 = vmul.f32 %v1816_v46, %v1340_v44 }
 0x24a   :  { %v1786_v55 = vadd.f32 %v1785_v12, %v1774_v52  ;;  %v1567_v3 = vadd.f32 %v1566_v17, %v4923_v9  ;;  %v1795_v11 = vstv %s4963_s0 }
 0x24b   :  { %v1778_v10 = vrot.slane %v1777_v25, 4  ;;  %v1834_v39 = vadd.f32 %v1833_v58, %v1831_v59  ;;  %v1863_v48 = vrot.slane %v1862_v41, 4  ;;  %v1832_v62 = vmul.f32 %v1820_v28, %v1820_v28 }
 0x24c   :  { %v1787_v51 = vrot.slane %v1786_v55, 4 }
 0x24d   :  { %v1779_v0 = vadd.f32 %v1778_v10, %v1777_v25  ;;  %v1835_v12 = vadd.f32 %v1834_v39, %v1832_v62  ;;  %v1864_v20 = vadd.f32 %v1863_v48, %v1862_v41 }
 0x24e   :  { %v1788_v61 = vadd.f32 %v1787_v51, %v1786_v55 }
 0x24f   :  { %v1780_v31 = vrot.slane %v1779_v0, 2  ;;  %v1836_v25 = vrot.slane %v1835_v12, 4  ;;  %v1865_v29 = vrot.slane %v1864_v20, 2 }
 0x250   :  { %v1789_v49 = vrot.slane %v1788_v61, 2 }
 0x251   :  { %v1781_v43 = vadd.f32 %v1780_v31, %v1779_v0  ;;  %v2717_v34 = vpop.f32.mrf.mxu0  ;;  %v1837_v24 = vadd.f32 %v1836_v25, %v1835_v12  ;;  %v1866_v0 = vadd.f32 %v1865_v29, %v1864_v20 }
 0x252   :  { %v1790_v38 = vadd.f32 %v1789_v49, %v1788_v61  ;;  %v1705_v4 = vadd.f32 %v2717_v34, %v1572_v36 }
 0x253   :  { %v1782_v21 = vrot.slane %v1781_v43, 1  ;;  %v1682_v56 = vpop.f32.mrf.mxu0  ;;  %v1838_v41 = vrot.slane %v1837_v24, 2  ;;  %v1867_v17 = vrot.slane %v1866_v0, 1 }
 0x254   :  { %v1791_v40 = vrot.slane %v1790_v38, 1  ;;  %v1699_v57 = vadd.f32 %v1682_v56, %v1564_v32  ;;  %v1823_v27 = vsub.f32 1.0, %v1705_v4  ;;  %v1873_v55 = vand.u32 2147483647, %v1705_v4 }
 0x255   :  { %v1783_v35 = vadd.f32 %v1782_v21, %v1781_v43  ;;  %v2718_v50 = vpop.f32.mrf.mxu0  ;;  %v1839_v59 = vadd.f32 %v1838_v41, %v1837_v24  ;;  %v1868_v28 = vadd.f32 %v1867_v17, %v1866_v0 }
 0x256   :  { %v1792_v5 = vadd.f32 %v1791_v40, %v1790_v38  ;;  %v1821_v54 = vsub.f32 1.0, %v1699_v57  ;;  %v1708_v6 = vadd.f32 %v2718_v50, %v1575_v63  ;;  %v1871_v42 = vand.u32 2147483647, %v1699_v57 }
 0x257   :  { %v1793_v1 = vadd.f32 %v1783_v35, %v1757_v37  ;;  %v1685_v15 = vpop.f32.mrf.mxu0  ;;  %v1827_v44 = vmul.f32 %v1823_v27, %v1705_v4  ;;  %v1840_v21 = vrot.slane %v1839_v59, 1  ;;  %v1869_v39 = vsub.f32 1.0, %v1868_v28 }
 0x258   :  { %v1794_v14 = vadd.f32 %v1792_v5, %v1766_v47  ;;  %v1702_v2 = vadd.f32 %v1685_v15, %v1567_v3  ;;  %v1825_v52 = vmul.f32 %v1821_v54, %v1699_v57  ;;  %v1824_v7 = vsub.f32 1.0, %v1708_v6 }
 0x259   :  { %1891 = vst.msk [vmem:[%s4969_s6] sm:$0x1] %vm4877_vm14, %v1793_v1  ;;  %v1874_v18 = vand.u32 2147483647, %v1708_v6  ;;  %v1844_v45 = vmul.f32 %v1827_v44, %v1827_v44  ;;  %v1841_v35 = vadd.f32 %v1840_v21, %v1839_v59  ;;  %v1870_v4 = vmax.f32 %v1869_v39, 0.0 }
 0x25a   :  { %v1796_v9 = vsub.f32 %v1795_v11, %v1794_v14  ;;  %v1822_v16 = vsub.f32 1.0, %v1702_v2  ;;  %v1872_v53 = vand.u32 2147483647, %v1702_v2  ;;  %v1842_v13 = vmul.f32 %v1825_v52, %v1825_v52 }
 0x25b   :  { %v1828_v51 = vmul.f32 %v1824_v7, %v1708_v6 }
 0x25c   :  { %v1797_v8 = vmax.f32 %v1796_v9, 0.0  ;;  %v1826_v10 = vmul.f32 %v1822_v16, %v1702_v2  ;;  %v1875_v19 = vadd.f32 %v1872_v53, %v1871_v42 }
 0x25d   :  { %v1845_v61 = vmul.f32 %v1828_v51, %v1828_v51 }
 0x25e   :  { %1892 = vst.msk [vmem:[%s4969_s6 + $0x1] sm:$0x1] %vm4877_vm14, %v1797_v8  ;;  %v1843_v23 = vmul.f32 %v1826_v10, %v1826_v10  ;;  %v1876_v22 = vadd.f32 %v1875_v19, %v1873_v55 }
 0x260   :  { %v1846_v46 = vadd.f32 %v1843_v23, %v1842_v13  ;;  %v1877_v60 = vadd.f32 %v1876_v22, %v1874_v18 }
 0x262   :  { %v1847_v31 = vadd.f32 %v1846_v46, %v1844_v45  ;;  %v1878_v58 = vrot.slane %v1877_v60, 4 }
 0x264   :  { %v1848_v49 = vadd.f32 %v1847_v31, %v1845_v61  ;;  %v1879_v30 = vadd.f32 %v1878_v58, %v1877_v60 }
 0x266   :  { %v1849_v43 = vrot.slane %v1848_v49, 4  ;;  %v1880_v26 = vrot.slane %v1879_v30, 2 }
 0x268   :  { %v1850_v38 = vadd.f32 %v1849_v43, %v1848_v49  ;;  %v1881_v34 = vadd.f32 %v1880_v26, %v1879_v30 }
 0x26a   :  { %v1851_v36 = vrot.slane %v1850_v38, 2  ;;  %v1882_v32 = vrot.slane %v1881_v34, 1 }
 0x26c   :  { %v1852_v48 = vadd.f32 %v1851_v36, %v1850_v38  ;;  %v1883_v40 = vadd.f32 %v1882_v32, %v1881_v34 }
 0x26e   :  { %v1853_v56 = vrot.slane %v1852_v48, 1  ;;  %v1884_v37 = vsub.f32 1.0, %v1883_v40 }
 0x270   :  { %v1854_v57 = vadd.f32 %v1853_v56, %v1852_v48  ;;  %v1885_v47 = vmax.f32 %v1884_v37, 0.0 }
 0x272   :  { %v1855_v62 = vadd.f32 %v1854_v57, %v1841_v35  ;;  %v1886_v63 = vadd.f32 %v1885_v47, %v1870_v4 }
 0x274   :  { %1894 = vst.msk [vmem:[%s4969_s6 + $0x3] sm:$0x1] %vm4877_vm14, %v1855_v62  ;;  %1895 = vst.msk [vmem:[%s4969_s6 + $0x4] sm:$0x1] %vm4877_vm14, %v1886_v63 }
 0x275   :  { %1900 = vsyncpa [#allocation4], 1 }
 0x276   :  { %1901 = vsyncpa [#allocation6], 1 }

</bundles_post_ra>
